<compile_context>
chip_gen: v5e
topology: v5e:2x2
jax: 0.10.0
libtpu: 0.0.40
codegen_flags: <defaults>
</compile_context>

<pallas_src>
import functools
from collections import namedtuple

import numpy as np
import jax
import jax.numpy as jnp
from jax import lax
from jax.experimental import pallas as pl
from jax.experimental.pallas import tpu as pltpu

DecoderOutput = namedtuple("DecoderOutput", ["i", "j", "pred", "pred_h", "pred_mask"])


def _logsumexp(x, axis):
    m = jnp.max(x, axis=axis, keepdims=True)
    return m + jnp.log(jnp.sum(jnp.exp(x - m), axis=axis, keepdims=True))


def _decoder_kernel(
    h_ref, e_ref,
    wn_ref, bn_ref,      # fused node weights  (H, 4*Hd+3) bf16, (1, 4*Hd+3) f32
    we_ref, be_ref,      # fused edge weights  (D, 2*Hd)  bf16, (1, 2*Hd)  f32
    w3_ref, b3_ref,      # block-diagonal decoders[3] of both heads: (2*Hd, 2) bf16, (1, 2) f32
    scal_ref, pred_ref, predh_ref,
    pn_scr,
    *, steps, temperature, hidden_dim, tile_j, n_nodes):
    jc = pl.program_id(1)
    nj = pl.num_programs(1)
    Hd = hidden_dim
    TJ = tile_j
    N = n_nodes

    dot = functools.partial(jnp.dot, preferred_element_type=jnp.float32)

    # ---- fused node-side matmul, once per batch element ----
    @pl.when(jc == 0)
    def _():
        h = h_ref[0].astype(jnp.bfloat16)                          # (N, H)
        pn = dot(h, wn_ref[...]) + bn_ref[...]                     # (N, 4*Hd+3) f32
        pn_scr[...] = pn
        # (N, 3) output block is a masked lane-width-3 store; tiny, kept for simplicity
        # (lane-dense (3, N) layout is a possible micro-opt).
        scal_ref[0] = pn[:, 4 * Hd:4 * Hd + 3]                     # stacked i / j / pred_mask

    j0 = pl.multiple_of(jc * TJ, TJ)
    p1 = pn_scr[...][:, 0:2 * Hd]                                  # (N, 2Hd)  decoders[0], [a|b]
    p2 = pn_scr[pl.ds(j0, TJ), :][:, 2 * Hd:4 * Hd]                # (TJ, 2Hd) decoders[1], [a|b]

    # ---- fused edge-side matmul on this chunk of j rows (edge passes the MXU once) ----
    e_flat = e_ref[0]                                              # (TJ*N, D) bf16, (j, i) rows
    p3 = (dot(e_flat, we_ref[...]) + be_ref[...]).reshape(TJ, N, 2 * Hd)   # f32

    # pm[jj, i, :] = max(p1[i, :], p2[j0+jj, :] + p3[jj, i, :]); both heads, head-contiguous,
    # so no Hd-boundary lane slices are needed.
    pm = jnp.maximum(p1[None, :, :], p2[:, None, :] + p3)          # (TJ, N, 2Hd) f32

    # decoders[3] of both heads as one block-diagonal MXU matmul (mul + reduce off the VPU/XLU).
    z = dot(pm.reshape(TJ * N, 2 * Hd).astype(jnp.bfloat16), w3_ref[...]) + b3_ref[...]
    z = z.reshape(TJ, N, 2)                                        # z[jj, i, 0/1] = pred/pred_h [i, j0+jj]

    # Accumulate transposed rows directly into the resident output blocks (no N^2 scratch).
    pred_ref[0, pl.ds(j0, TJ), :] = z[..., 0]
    predh_ref[0, pl.ds(j0, TJ), :] = z[..., 1]

    # ---- finalize: transpose the (N, N) results in place, run sinkhorn on `pred` ----
    @pl.when(jc == nj - 1)
    def _():
        ph_t = predh_ref[0]
        predh_ref[0] = ph_t.T
        # TODO(synk): training-mode Gumbel noise (torch.rand on the logits) omitted; eval-mode.
        x = pred_ref[0].T / temperature
        row = lax.broadcasted_iota(jnp.int32, (N, N), 0)
        col = lax.broadcasted_iota(jnp.int32, (N, N), 1)
        x = x - 1e6 * (row == col).astype(x.dtype)
        # f32 sinkhorn; on v6e/v7x a bf16 exp (f32 max/accumulate/log) would ~double EUP
        # throughput of this phase — left in f32 to stay close to the PyTorch reference.
        for _ in range(steps):                     # static full unroll (steps small & fixed)
            x = x - _logsumexp(x, axis=-1)         # log_softmax over dim=-1
            x = x - _logsumexp(x, axis=-2)         # log_softmax over dim=-2
        pred_ref[0] = x


def _const_spec(shape):
    nd = len(shape)
    return pl.BlockSpec(shape, lambda b, jc, n=nd: (0,) * n)


def _pick_tile_and_vmem(N, H, D, Hd):
    """Generation-aware j-tile size and VMEM limit."""
    try:
        cap = int(pltpu.get_tpu_info().vmem_capacity_bytes)
    except Exception:
        cap = 64 << 20                                   # conservative fallback (v7x-sized)
    budget = (cap * 3) // 4                              # ~96 MiB on v5e/v6e, ~48 MiB on v7x
    # Resident for the whole grid: pred/pred_h output blocks (double-buffered f32), node block
    # (double-buffered), the fused node-matmul scratch, weights, plus slack for temporaries.
    resident = (16 * N * N
                + 8 * N * H
                + 4 * N * (4 * Hd + 3)
                + 8 * (H + D + 4) * (4 * Hd + 3)
                + (2 << 20))
    # Per j-row: double-buffered bf16 edge rows + p3 / pm f32 + pm bf16 copy + margin.
    per_row = N * (8 * D + 24 * Hd) + 1024
    avail = budget - resident
    tj = int(max(1, min(N, avail // per_row))) if avail > per_row else 1
    if N % 8 != 0:
        tj = N                    # keep the (8,128) block rule via full-extent blocks
    else:
        # Prefer the largest divisor of N that is a multiple of 8 and fits the budget.
        # TODO(synk): a cdiv grid + masked tail would avoid degrading to tiny TJ when N has
        # few divisors (perf only, not correctness).
        divs = [d for d in range(1, N + 1) if N % d == 0 and d <= max(tj, 1)]
        divs8 = [d for d in divs if d % 8 == 0]
        tj = max(divs8) if divs8 else max(divs)
    vmem_limit = int(min(cap, max(budget, resident + 2 * per_row * tj)))
    return tj, vmem_limit


def feature_decoder_forward(node_features, edge_features, params, *,
                            steps=10, temperature=0.1):
    B, N, H = node_features.shape
    D = edge_features.shape[-1]
    pa, pb = params["pred"], params["pred_h"]
    Hd = pa["w0"].shape[1]

    # Fuse the narrow Linears into wide MXU calls, head-contiguous ordering:
    #   p1 = cols [0:2Hd], p2 = cols [2Hd:4Hd], scal = cols [4Hd:4Hd+3]; p3 = [w2_a | w2_b].
    wn = jnp.concatenate([pa["w0"], pb["w0"], pa["w1"], pb["w1"], params["ws"]], axis=1)
    bn = jnp.concatenate([pa["b0"], pb["b0"], pa["b1"], pb["b1"], params["bs"]], axis=1)
    we = jnp.concatenate([pa["w2"], pb["w2"]], axis=1)              # (D, 2Hd)
    be = jnp.concatenate([pa["b2"], pb["b2"]], axis=1)              # (1, 2Hd)
    zeros = jnp.zeros((Hd, 1), jnp.float32)
    w3 = jnp.concatenate([jnp.concatenate([pa["w3"], zeros], axis=1),
                          jnp.concatenate([zeros, pb["w3"]], axis=1)], axis=0)  # (2Hd, 2) blkdiag
    b3 = jnp.concatenate([pa["b3"], pb["b3"]], axis=1)              # (1, 2)
    wn = wn.astype(jnp.bfloat16)
    we = we.astype(jnp.bfloat16)
    w3 = w3.astype(jnp.bfloat16)

    # Edge tensor: flatten the (j, i) axes and feed as bf16 -> half the dominant HBM DMA and no
    # in-kernel bf16 shadow copy.  Pass bf16 from the producer when possible so the cast fuses
    # upstream instead of being a standalone HBM pass.
    e_flat = edge_features.reshape(B, N * N, D)
    if e_flat.dtype != jnp.bfloat16:
        e_flat = e_flat.astype(jnp.bfloat16)

    TJ, vmem_limit = _pick_tile_and_vmem(N, H, D, Hd)
    NJ = N // TJ

    weight_args = [wn, bn, we, be, w3, b3]
    in_specs = [
        pl.BlockSpec((1, N, H), lambda b, jc: (b, 0, 0)),
        # NOTE: on v5e, if the edge DMA is exposed, pipeline_mode=pl.Buffered(3) here is the knob.
        pl.BlockSpec((1, TJ * N, D), lambda b, jc: (b, jc, 0)),
    ] + [_const_spec(w.shape) for w in weight_args]

    out_shapes = (
        jax.ShapeDtypeStruct((B, N, 3), jnp.float32),   # stacked i / j / pred_mask
        jax.ShapeDtypeStruct((B, N, N), jnp.float32),   # pred
        jax.ShapeDtypeStruct((B, N, N), jnp.float32),   # pred_h
    )
    out_specs = (
        pl.BlockSpec((1, N, 3), lambda b, jc: (b, 0, 0)),
        pl.BlockSpec((1, N, N), lambda b, jc: (b, 0, 0)),
        pl.BlockSpec((1, N, N), lambda b, jc: (b, 0, 0)),
    )
    scratch_shapes = [
        pltpu.VMEM((N, 4 * Hd + 3), jnp.float32),       # fused node-matmul result
    ]

    flops = B * (2 * N * H * (4 * Hd + 3)        # fused node matmul
                 + 2 * N * N * D * 2 * Hd        # fused edge matmul
                 + 2 * N * N * 2 * Hd * 2        # block-diagonal reduce matmul
                 + 6 * N * N * Hd                # max / add, both heads
                 + steps * 8 * N * N)            # sinkhorn adds/subs
    transcendentals = B * steps * 2 * N * N
    bytes_accessed = (2 * B * N * N * D + 4 * B * N * H
                      + 4 * B * (2 * N * N + 3 * N)
                      + 2 * (wn.size + we.size + w3.size)
                      + 4 * (bn.size + be.size + b3.size))
    cost = pl.CostEstimate(flops=int(flops), transcendentals=int(transcendentals),
                           bytes_accessed=int(bytes_accessed))

    kernel = functools.partial(_decoder_kernel, steps=steps, temperature=temperature,
                               hidden_dim=Hd, tile_j=TJ, n_nodes=N)
    # TODO(synk): v7x megacore — only the batch axis is "parallel"; for B == 1 either tile the
    # i axis with a second parallel grid axis or split sinkhorn into a (B,)-parallel call.
    scal, pred, pred_h = pl.pallas_call(
        kernel,
        out_shape=out_shapes,
        grid=(B, NJ),
        in_specs=in_specs,
        out_specs=out_specs,
        scratch_shapes=scratch_shapes,
        compiler_params=pltpu.CompilerParams(
            dimension_semantics=("parallel", "arbitrary"),
            vmem_limit_bytes=vmem_limit),
        cost_estimate=cost,
    )(node_features, e_flat, *weight_args)

    return DecoderOutput(i=scal[:, :, 0], j=scal[:, :, 1], pred=pred,
                         pred_h=pred_h, pred_mask=scal[:, :, 2])


# ----------------------- deterministic parameter init -----------------------

def _init_linear(key, in_dim, out_dim):
    k = 1.0 / np.sqrt(in_dim)
    wkey, bkey = jax.random.split(key)
    w = jax.random.uniform(wkey, (in_dim, out_dim), jnp.float32, -k, k)
    b = jax.random.uniform(bkey, (1, out_dim), jnp.float32, -k, k)
    return w, b


def init_params(key, node_hidden_dim, input_dim, hidden_dim):
    H, D, Hd = node_hidden_dim, input_dim, hidden_dim
    keys = jax.random.split(key, 5)
    wi, bi = _init_linear(keys[0], H, 1)   # i_decoder
    wj, bj = _init_linear(keys[1], H, 1)   # j_decoder
    wm, bm = _init_linear(keys[2], H, 1)   # pred_mask_decoder
    ws = jnp.concatenate([wi, wj, wm], axis=1)   # (H, 3)
    bs = jnp.concatenate([bi, bj, bm], axis=1)   # (1, 3)

    def dec(k):
        ks = jax.random.split(k, 4)
        w0, b0 = _init_linear(ks[0], H, Hd)
        w1, b1 = _init_linear(ks[1], H, Hd)
        w2, b2 = _init_linear(ks[2], D, Hd)
        w3, b3 = _init_linear(ks[3], Hd, 1)   # Linear(input_dim, 1); requires D == Hd
        return dict(w0=w0, b0=b0, w1=w1, b1=b1, w2=w2, b2=b2, w3=w3, b3=b3)

    return dict(ws=ws, bs=bs, pred=dec(keys[3]), pred_h=dec(keys[4]))


# ----------------------- pure-JAX reference (for checking) -----------------------
# Uses the same bf16-operand / f32-accumulate convention as the kernel (incl. the final reduce).

def _reference(node_features, edge_features, params, *, steps=10, temperature=0.1):
    def mm(x, w):
        return jnp.einsum("...i,ij->...j", x.astype(jnp.bfloat16), w.astype(jnp.bfloat16),
                          preferred_element_type=jnp.float32)

    scal = mm(node_features, params["ws"]) + params["bs"]              # (B, N, 3)

    def decode_pred_h(dp, h, e):
        p1 = mm(h, dp["w0"]) + dp["b0"]                                # (B, N, Hd)
        p2 = mm(h, dp["w1"]) + dp["b1"]                                # (B, N, Hd)
        p3 = mm(e, dp["w2"]) + dp["b2"]                                # (B, N, N, Hd)
        pe = p2[:, :, None, :] + p3
        pm = jnp.maximum(p1[:, :, None, :], jnp.transpose(pe, (0, 2, 1, 3)))
        return mm(pm, dp["w3"])[..., 0] + dp["b3"][0, 0]

    x = decode_pred_h(params["pred"], node_features, edge_features)
    pred_h = decode_pred_h(params["pred_h"], node_features, edge_features)

    x = x / temperature
    x = x - 1e6 * jnp.eye(x.shape[-1], dtype=x.dtype)
    for _ in range(steps):
        x = jax.nn.log_softmax(x, axis=-1)
        x = jax.nn.log_softmax(x, axis=-2)

    return DecoderOutput(i=scal[:, :, 0], j=scal[:, :, 1], pred=x,
                         pred_h=pred_h, pred_mask=scal[:, :, 2])


if __name__ == "__main__":
    B, N = 2, 8
    node_hidden_dim, input_dim, hidden_dim = 32, 32, 32   # input_dim == hidden_dim (module constraint)

    key = jax.random.PRNGKey(0)
    k_node, k_edge, k_param = jax.random.split(key, 3)
    node_features = jax.random.normal(k_node, (B, N, node_hidden_dim), jnp.float32)
    edge_features = jax.random.normal(k_edge, (B, N, N, input_dim), jnp.float32)
    params = init_params(k_param, node_hidden_dim, input_dim, hidden_dim)

    out = feature_decoder_forward(node_features, edge_features, params)
    out = jax.block_until_ready(out)

    ref = _reference(node_features, edge_features, params)
    for name in DecoderOutput._fields:
        np.testing.assert_allclose(np.asarray(getattr(out, name)),
                                   np.asarray(getattr(ref, name)),
                                   rtol=1e-4, atol=1e-2, err_msg=name)

    print("KERNEL_OK")
</pallas_src>

<mosaic_0001>
module attributes {stable_mosaic.version = 11 : i64} {
  func.func @_decoder_kernel(%arg0: i32, %arg1: i32, %arg2: memref<1x8x32xf32, #tpu.memory_space<vmem>>, %arg3: memref<1x64x32xbf16, #tpu.memory_space<vmem>>, %arg4: memref<32x131xbf16, #tpu.memory_space<vmem>>, %arg5: memref<1x131xf32, #tpu.memory_space<vmem>>, %arg6: memref<32x64xbf16, #tpu.memory_space<vmem>>, %arg7: memref<1x64xf32, #tpu.memory_space<vmem>>, %arg8: memref<64x2xbf16, #tpu.memory_space<vmem>>, %arg9: memref<1x2xf32, #tpu.memory_space<vmem>>, %arg10: memref<1x8x3xf32, #tpu.memory_space<vmem>>, %arg11: memref<1x8x8xf32, #tpu.memory_space<vmem>>, %arg12: memref<1x8x8xf32, #tpu.memory_space<vmem>>, %arg13: memref<8x131xf32, #tpu.memory_space<vmem>>) attributes {dimension_semantics = [#tpu.dimension_semantics<parallel>, #tpu.dimension_semantics<arbitrary>], iteration_bounds = array<i64: 2, 1>, scalar_prefetch = 0 : i64, scratch_operands = 1 : i64, tpu.core_type = #tpu.core_type<tc>, window_params = [{transform_indices = @transform_0, window_bounds = array<i64: 1, 8, 32>}, {transform_indices = @transform_1, window_bounds = array<i64: 1, 64, 32>}, {pipeline_mode = #tpu.pipeline_mode<synchronous>, transform_indices = @transform_2, window_bounds = array<i64: 32, 131>}, {pipeline_mode = #tpu.pipeline_mode<synchronous>, transform_indices = @transform_3, window_bounds = array<i64: 1, 131>}, {pipeline_mode = #tpu.pipeline_mode<synchronous>, transform_indices = @transform_4, window_bounds = array<i64: 32, 64>}, {pipeline_mode = #tpu.pipeline_mode<synchronous>, transform_indices = @transform_5, window_bounds = array<i64: 1, 64>}, {pipeline_mode = #tpu.pipeline_mode<synchronous>, transform_indices = @transform_6, window_bounds = array<i64: 64, 2>}, {pipeline_mode = #tpu.pipeline_mode<synchronous>, transform_indices = @transform_7, window_bounds = array<i64: 1, 2>}, {transform_indices = @transform_8, window_bounds = array<i64: 1, 8, 3>}, {transform_indices = @transform_9, window_bounds = array<i64: 1, 8, 8>}, {transform_indices = @transform_10, window_bounds = array<i64: 1, 8, 8>}]} {
    %c0_i32 = arith.constant 0 : i32
    %0 = arith.cmpi eq, %arg1, %c0_i32 : i32
    %1 = arith.extui %0 : i1 to i32
    %c0_i32_0 = arith.constant 0 : i32
    %2 = arith.cmpi ne, %1, %c0_i32_0 : i32
    scf.if %2 {
      %c0_21 = arith.constant 0 : index
      %c0_22 = arith.constant 0 : index
      %c0_23 = arith.constant 0 : index
      %47 = vector.load %arg2[%c0_21, %c0_22, %c0_23] : memref<1x8x32xf32, #tpu.memory_space<vmem>>, vector<1x8x32xf32>
      %48 = vector.shape_cast %47 : vector<1x8x32xf32> to vector<8x32xf32>
      %49 = arith.truncf %48 : vector<8x32xf32> to vector<8x32xbf16>
      %c0_24 = arith.constant 0 : index
      %c0_25 = arith.constant 0 : index
      %50 = vector.load %arg4[%c0_24, %c0_25] : memref<32x131xbf16, #tpu.memory_space<vmem>>, vector<32x131xbf16>
      %cst_26 = arith.constant dense<0.000000e+00> : vector<8x131xf32>
      %51 = tpu.matmul %49, %50, %cst_26 {dimension_numbers = #tpu.dot_dimension_numbers<[1], [0], [0], [1], [0, 0, 1, 1], [], []>} : vector<8x32xbf16>, vector<32x131xbf16>, vector<8x131xf32> -> vector<8x131xf32>
      %c0_27 = arith.constant 0 : index
      %c0_28 = arith.constant 0 : index
      %52 = vector.load %arg5[%c0_27, %c0_28] : memref<1x131xf32, #tpu.memory_space<vmem>>, vector<1x131xf32>
      %53 = vector.broadcast %52 : vector<1x131xf32> to vector<8x131xf32>
      %54 = arith.addf %51, %53 : vector<8x131xf32>
      %c0_29 = arith.constant 0 : index
      %c0_30 = arith.constant 0 : index
      %55 = vector.load %arg13[%c0_29, %c0_30] : memref<8x131xf32, #tpu.memory_space<vmem>>, vector<8x131xf32>
      tpu.vector_store %arg13[%c0_29, %c0_30], %54 {strides = array<i32>} : memref<8x131xf32, #tpu.memory_space<vmem>>, vector<8x131xf32>,
      %56 = vector.extract_strided_slice %54 {offsets = [0, 128], sizes = [8, 3], strides = [1, 1]} : vector<8x131xf32> to vector<8x3xf32>
      %c0_31 = arith.constant 0 : index
      %c0_32 = arith.constant 0 : index
      %c0_33 = arith.constant 0 : index
      %57 = vector.load %arg10[%c0_31, %c0_32, %c0_33] : memref<1x8x3xf32, #tpu.memory_space<vmem>>, vector<1x8x3xf32>
      %58 = vector.shape_cast %57 : vector<1x8x3xf32> to vector<8x3xf32>
      %59 = vector.shape_cast %56 : vector<8x3xf32> to vector<1x8x3xf32>
      tpu.vector_store %arg10[%c0_31, %c0_32, %c0_33], %59 {strides = array<i32>} : memref<1x8x3xf32, #tpu.memory_space<vmem>>, vector<1x8x3xf32>,
    } else {
    }
    %c8_i32 = arith.constant 8 : i32
    %3 = arith.muli %arg1, %c8_i32 : i32
    %4 = tpu.assume_multiple %3, 8 : i32
    %c0 = arith.constant 0 : index
    %c0_1 = arith.constant 0 : index
    %5 = vector.load %arg13[%c0, %c0_1] : memref<8x131xf32, #tpu.memory_space<vmem>>, vector<8x131xf32>
    %6 = vector.extract_strided_slice %5 {offsets = [0, 0], sizes = [8, 64], strides = [1, 1]} : vector<8x131xf32> to vector<8x64xf32>
    %7 = arith.index_cast %4 : i32 to index
    %c0_2 = arith.constant 0 : index
    %8 = vector.load %arg13[%7, %c0_2] : memref<8x131xf32, #tpu.memory_space<vmem>>, vector<8x131xf32>
    %9 = vector.extract_strided_slice %8 {offsets = [0, 64], sizes = [8, 64], strides = [1, 1]} : vector<8x131xf32> to vector<8x64xf32>
    %c0_3 = arith.constant 0 : index
    %c0_4 = arith.constant 0 : index
    %c0_5 = arith.constant 0 : index
    %10 = vector.load %arg3[%c0_3, %c0_4, %c0_5] : memref<1x64x32xbf16, #tpu.memory_space<vmem>>, vector<1x64x32xbf16>
    %11 = vector.shape_cast %10 : vector<1x64x32xbf16> to vector<64x32xbf16>
    %c0_6 = arith.constant 0 : index
    %c0_7 = arith.constant 0 : index
    %12 = vector.load %arg6[%c0_6, %c0_7] : memref<32x64xbf16, #tpu.memory_space<vmem>>, vector<32x64xbf16>
    %cst = arith.constant dense<0.000000e+00> : vector<64x64xf32>
    %13 = tpu.matmul %11, %12, %cst {dimension_numbers = #tpu.dot_dimension_numbers<[1], [0], [0], [1], [0, 0, 1, 1], [], []>} : vector<64x32xbf16>, vector<32x64xbf16>, vector<64x64xf32> -> vector<64x64xf32>
    %c0_8 = arith.constant 0 : index
    %c0_9 = arith.constant 0 : index
    %14 = vector.load %arg7[%c0_8, %c0_9] : memref<1x64xf32, #tpu.memory_space<vmem>>, vector<1x64xf32>
    %15 = vector.broadcast %14 : vector<1x64xf32> to vector<64x64xf32>
    %16 = arith.addf %13, %15 : vector<64x64xf32>
    %17 = vector.shape_cast %16 : vector<64x64xf32> to vector<8x8x64xf32>
    %18 = vector.shape_cast %6 : vector<8x64xf32> to vector<1x8x64xf32>
    %19 = vector.shape_cast %9 : vector<8x64xf32> to vector<8x1x64xf32>
    %20 = vector.broadcast %19 : vector<8x1x64xf32> to vector<8x8x64xf32>
    %21 = arith.addf %20, %17 : vector<8x8x64xf32>
    %22 = vector.broadcast %18 : vector<1x8x64xf32> to vector<8x8x64xf32>
    %23 = arith.maximumf %22, %21 : vector<8x8x64xf32>
    %24 = vector.shape_cast %23 : vector<8x8x64xf32> to vector<64x64xf32>
    %25 = arith.truncf %24 : vector<64x64xf32> to vector<64x64xbf16>
    %c0_10 = arith.constant 0 : index
    %c0_11 = arith.constant 0 : index
    %26 = vector.load %arg8[%c0_10, %c0_11] : memref<64x2xbf16, #tpu.memory_space<vmem>>, vector<64x2xbf16>
    %cst_12 = arith.constant dense<0.000000e+00> : vector<64x2xf32>
    %27 = tpu.matmul %25, %26, %cst_12 {dimension_numbers = #tpu.dot_dimension_numbers<[1], [0], [0], [1], [0, 0, 1, 1], [], []>} : vector<64x64xbf16>, vector<64x2xbf16>, vector<64x2xf32> -> vector<64x2xf32>
    %c0_13 = arith.constant 0 : index
    %c0_14 = arith.constant 0 : index
    %28 = vector.load %arg9[%c0_13, %c0_14] : memref<1x2xf32, #tpu.memory_space<vmem>>, vector<1x2xf32>
    %29 = vector.broadcast %28 : vector<1x2xf32> to vector<64x2xf32>
    %30 = arith.addf %27, %29 : vector<64x2xf32>
    %31 = vector.shape_cast %30 : vector<64x2xf32> to vector<8x8x2xf32>
    %32 = vector.extract_strided_slice %31 {offsets = [0, 0, 0], sizes = [8, 8, 1], strides = [1, 1, 1]} : vector<8x8x2xf32> to vector<8x8x1xf32>
    %33 = vector.shape_cast %32 : vector<8x8x1xf32> to vector<8x8xf32>
    %c0_15 = arith.constant 0 : index
    %34 = arith.index_cast %4 : i32 to index
    %c0_16 = arith.constant 0 : index
    %35 = vector.load %arg11[%c0_15, %34, %c0_16] : memref<1x8x8xf32, #tpu.memory_space<vmem>>, vector<1x8x8xf32>
    %36 = vector.shape_cast %35 : vector<1x8x8xf32> to vector<8x8xf32>
    %37 = vector.shape_cast %33 : vector<8x8xf32> to vector<1x8x8xf32>
    tpu.vector_store %arg11[%c0_15, %34, %c0_16], %37 {strides = array<i32>} : memref<1x8x8xf32, #tpu.memory_space<vmem>>, vector<1x8x8xf32>,
    %38 = vector.extract_strided_slice %31 {offsets = [0, 0, 1], sizes = [8, 8, 1], strides = [1, 1, 1]} : vector<8x8x2xf32> to vector<8x8x1xf32>
    %39 = vector.shape_cast %38 : vector<8x8x1xf32> to vector<8x8xf32>
    %c0_17 = arith.constant 0 : index
    %40 = arith.index_cast %4 : i32 to index
    %c0_18 = arith.constant 0 : index
    %41 = vector.load %arg12[%c0_17, %40, %c0_18] : memref<1x8x8xf32, #tpu.memory_space<vmem>>, vector<1x8x8xf32>
    %42 = vector.shape_cast %41 : vector<1x8x8xf32> to vector<8x8xf32>
    %43 = vector.shape_cast %39 : vector<8x8xf32> to vector<1x8x8xf32>
    tpu.vector_store %arg12[%c0_17, %40, %c0_18], %43 {strides = array<i32>} : memref<1x8x8xf32, #tpu.memory_space<vmem>>, vector<1x8x8xf32>,
    %c0_i32_19 = arith.constant 0 : i32
    %44 = arith.cmpi eq, %arg1, %c0_i32_19 : i32
    %45 = arith.extui %44 : i1 to i32
    %c0_i32_20 = arith.constant 0 : i32
    %46 = arith.cmpi ne, %45, %c0_i32_20 : i32
    scf.if %46 {
      %c0_21 = arith.constant 0 : index
      %c0_22 = arith.constant 0 : index
      %c0_23 = arith.constant 0 : index
      %47 = vector.load %arg12[%c0_21, %c0_22, %c0_23] : memref<1x8x8xf32, #tpu.memory_space<vmem>>, vector<1x8x8xf32>
      %48 = vector.shape_cast %47 : vector<1x8x8xf32> to vector<8x8xf32>
      %49 = tpu.transpose %48, [1, 0] : vector<8x8xf32> -> vector<8x8xf32>
      %c0_24 = arith.constant 0 : index
      %c0_25 = arith.constant 0 : index
      %c0_26 = arith.constant 0 : index
      %50 = vector.load %arg12[%c0_24, %c0_25, %c0_26] : memref<1x8x8xf32, #tpu.memory_space<vmem>>, vector<1x8x8xf32>
      %51 = vector.shape_cast %50 : vector<1x8x8xf32> to vector<8x8xf32>
      %52 = vector.shape_cast %49 : vector<8x8xf32> to vector<1x8x8xf32>
      tpu.vector_store %arg12[%c0_24, %c0_25, %c0_26], %52 {strides = array<i32>} : memref<1x8x8xf32, #tpu.memory_space<vmem>>, vector<1x8x8xf32>,
      %c0_27 = arith.constant 0 : index
      %c0_28 = arith.constant 0 : index
      %c0_29 = arith.constant 0 : index
      %53 = vector.load %arg11[%c0_27, %c0_28, %c0_29] : memref<1x8x8xf32, #tpu.memory_space<vmem>>, vector<1x8x8xf32>
      %54 = vector.shape_cast %53 : vector<1x8x8xf32> to vector<8x8xf32>
      %55 = tpu.transpose %54, [1, 0] : vector<8x8xf32> -> vector<8x8xf32>
      %cst_30 = arith.constant 1.000000e-01 : f32
      %56 = vector.broadcast %cst_30 : f32 to vector<8x8xf32>
      %57 = arith.divf %55, %56 : vector<8x8xf32>
      %58 = tpu.iota {dimensions = array<i32: 0>} : vector<8x8xi32>
      %59 = tpu.iota {dimensions = array<i32: 1>} : vector<8x8xi32>
      %60 = arith.cmpi eq, %58, %59 : vector<8x8xi32>
      %61 = arith.extui %60 : vector<8x8xi1> to vector<8x8xi32>
      %62 = arith.sitofp %61 : vector<8x8xi32> to vector<8x8xf32>
      %cst_31 = arith.constant 1.000000e+06 : f32
      %63 = vector.broadcast %cst_31 : f32 to vector<8x8xf32>
      %64 = arith.mulf %63, %62 : vector<8x8xf32>
      %65 = arith.subf %57, %64 : vector<8x8xf32>
      %cst_32 = arith.constant dense<0xFF800000> : vector<8xf32>
      %66 = vector.multi_reduction <maximumf>, %65, %cst_32 [1] : vector<8x8xf32> to vector<8xf32>
      %67 = vector.shape_cast %66 : vector<8xf32> to vector<8x1xf32>
      %68 = vector.broadcast %67 : vector<8x1xf32> to vector<8x8xf32>
      %69 = arith.subf %65, %68 : vector<8x8xf32>
      %70 = math.exp %69 : vector<8x8xf32>
      %cst_33 = arith.constant dense<0.000000e+00> : vector<8xf32>
      %71 = vector.multi_reduction <add>, %70, %cst_33 [1] : vector<8x8xf32> to vector<8xf32>
      %72 = vector.shape_cast %71 : vector<8xf32> to vector<8x1xf32>
      %73 = math.log %72 : vector<8x1xf32>
      %74 = arith.addf %67, %73 : vector<8x1xf32>
      %75 = vector.broadcast %74 : vector<8x1xf32> to vector<8x8xf32>
      %76 = arith.subf %65, %75 : vector<8x8xf32>
      %cst_34 = arith.constant dense<0xFF800000> : vector<8xf32>
      %77 = vector.multi_reduction <maximumf>, %76, %cst_34 [0] : vector<8x8xf32> to vector<8xf32>
      %78 = vector.shape_cast %77 : vector<8xf32> to vector<1x8xf32>
      %79 = vector.broadcast %78 : vector<1x8xf32> to vector<8x8xf32>
      %80 = arith.subf %76, %79 : vector<8x8xf32>
      %81 = math.exp %80 : vector<8x8xf32>
      %cst_35 = arith.constant dense<0.000000e+00> : vector<8xf32>
      %82 = vector.multi_reduction <add>, %81, %cst_35 [0] : vector<8x8xf32> to vector<8xf32>
      %83 = vector.shape_cast %82 : vector<8xf32> to vector<1x8xf32>
      %84 = math.log %83 : vector<1x8xf32>
      %85 = arith.addf %78, %84 : vector<1x8xf32>
      %86 = vector.broadcast %85 : vector<1x8xf32> to vector<8x8xf32>
      %87 = arith.subf %76, %86 : vector<8x8xf32>
      %cst_36 = arith.constant dense<0xFF800000> : vector<8xf32>
      %88 = vector.multi_reduction <maximumf>, %87, %cst_36 [1] : vector<8x8xf32> to vector<8xf32>
      %89 = vector.shape_cast %88 : vector<8xf32> to vector<8x1xf32>
      %90 = vector.broadcast %89 : vector<8x1xf32> to vector<8x8xf32>
      %91 = arith.subf %87, %90 : vector<8x8xf32>
      %92 = math.exp %91 : vector<8x8xf32>
      %cst_37 = arith.constant dense<0.000000e+00> : vector<8xf32>
      %93 = vector.multi_reduction <add>, %92, %cst_37 [1] : vector<8x8xf32> to vector<8xf32>
      %94 = vector.shape_cast %93 : vector<8xf32> to vector<8x1xf32>
      %95 = math.log %94 : vector<8x1xf32>
      %96 = arith.addf %89, %95 : vector<8x1xf32>
      %97 = vector.broadcast %96 : vector<8x1xf32> to vector<8x8xf32>
      %98 = arith.subf %87, %97 : vector<8x8xf32>
      %cst_38 = arith.constant dense<0xFF800000> : vector<8xf32>
      %99 = vector.multi_reduction <maximumf>, %98, %cst_38 [0] : vector<8x8xf32> to vector<8xf32>
      %100 = vector.shape_cast %99 : vector<8xf32> to vector<1x8xf32>
      %101 = vector.broadcast %100 : vector<1x8xf32> to vector<8x8xf32>
      %102 = arith.subf %98, %101 : vector<8x8xf32>
      %103 = math.exp %102 : vector<8x8xf32>
      %cst_39 = arith.constant dense<0.000000e+00> : vector<8xf32>
      %104 = vector.multi_reduction <add>, %103, %cst_39 [0] : vector<8x8xf32> to vector<8xf32>
      %105 = vector.shape_cast %104 : vector<8xf32> to vector<1x8xf32>
      %106 = math.log %105 : vector<1x8xf32>
      %107 = arith.addf %100, %106 : vector<1x8xf32>
      %108 = vector.broadcast %107 : vector<1x8xf32> to vector<8x8xf32>
      %109 = arith.subf %98, %108 : vector<8x8xf32>
      %cst_40 = arith.constant dense<0xFF800000> : vector<8xf32>
      %110 = vector.multi_reduction <maximumf>, %109, %cst_40 [1] : vector<8x8xf32> to vector<8xf32>
      %111 = vector.shape_cast %110 : vector<8xf32> to vector<8x1xf32>
      %112 = vector.broadcast %111 : vector<8x1xf32> to vector<8x8xf32>
      %113 = arith.subf %109, %112 : vector<8x8xf32>
      %114 = math.exp %113 : vector<8x8xf32>
      %cst_41 = arith.constant dense<0.000000e+00> : vector<8xf32>
      %115 = vector.multi_reduction <add>, %114, %cst_41 [1] : vector<8x8xf32> to vector<8xf32>
      %116 = vector.shape_cast %115 : vector<8xf32> to vector<8x1xf32>
      %117 = math.log %116 : vector<8x1xf32>
      %118 = arith.addf %111, %117 : vector<8x1xf32>
      %119 = vector.broadcast %118 : vector<8x1xf32> to vector<8x8xf32>
      %120 = arith.subf %109, %119 : vector<8x8xf32>
      %cst_42 = arith.constant dense<0xFF800000> : vector<8xf32>
      %121 = vector.multi_reduction <maximumf>, %120, %cst_42 [0] : vector<8x8xf32> to vector<8xf32>
      %122 = vector.shape_cast %121 : vector<8xf32> to vector<1x8xf32>
      %123 = vector.broadcast %122 : vector<1x8xf32> to vector<8x8xf32>
      %124 = arith.subf %120, %123 : vector<8x8xf32>
      %125 = math.exp %124 : vector<8x8xf32>
      %cst_43 = arith.constant dense<0.000000e+00> : vector<8xf32>
      %126 = vector.multi_reduction <add>, %125, %cst_43 [0] : vector<8x8xf32> to vector<8xf32>
      %127 = vector.shape_cast %126 : vector<8xf32> to vector<1x8xf32>
      %128 = math.log %127 : vector<1x8xf32>
      %129 = arith.addf %122, %128 : vector<1x8xf32>
      %130 = vector.broadcast %129 : vector<1x8xf32> to vector<8x8xf32>
      %131 = arith.subf %120, %130 : vector<8x8xf32>
      %cst_44 = arith.constant dense<0xFF800000> : vector<8xf32>
      %132 = vector.multi_reduction <maximumf>, %131, %cst_44 [1] : vector<8x8xf32> to vector<8xf32>
      %133 = vector.shape_cast %132 : vector<8xf32> to vector<8x1xf32>
      %134 = vector.broadcast %133 : vector<8x1xf32> to vector<8x8xf32>
      %135 = arith.subf %131, %134 : vector<8x8xf32>
      %136 = math.exp %135 : vector<8x8xf32>
      %cst_45 = arith.constant dense<0.000000e+00> : vector<8xf32>
      %137 = vector.multi_reduction <add>, %136, %cst_45 [1] : vector<8x8xf32> to vector<8xf32>
      %138 = vector.shape_cast %137 : vector<8xf32> to vector<8x1xf32>
      %139 = math.log %138 : vector<8x1xf32>
      %140 = arith.addf %133, %139 : vector<8x1xf32>
      %141 = vector.broadcast %140 : vector<8x1xf32> to vector<8x8xf32>
      %142 = arith.subf %131, %141 : vector<8x8xf32>
      %cst_46 = arith.constant dense<0xFF800000> : vector<8xf32>
      %143 = vector.multi_reduction <maximumf>, %142, %cst_46 [0] : vector<8x8xf32> to vector<8xf32>
      %144 = vector.shape_cast %143 : vector<8xf32> to vector<1x8xf32>
      %145 = vector.broadcast %144 : vector<1x8xf32> to vector<8x8xf32>
      %146 = arith.subf %142, %145 : vector<8x8xf32>
      %147 = math.exp %146 : vector<8x8xf32>
      %cst_47 = arith.constant dense<0.000000e+00> : vector<8xf32>
      %148 = vector.multi_reduction <add>, %147, %cst_47 [0] : vector<8x8xf32> to vector<8xf32>
      %149 = vector.shape_cast %148 : vector<8xf32> to vector<1x8xf32>
      %150 = math.log %149 : vector<1x8xf32>
      %151 = arith.addf %144, %150 : vector<1x8xf32>
      %152 = vector.broadcast %151 : vector<1x8xf32> to vector<8x8xf32>
      %153 = arith.subf %142, %152 : vector<8x8xf32>
      %cst_48 = arith.constant dense<0xFF800000> : vector<8xf32>
      %154 = vector.multi_reduction <maximumf>, %153, %cst_48 [1] : vector<8x8xf32> to vector<8xf32>
      %155 = vector.shape_cast %154 : vector<8xf32> to vector<8x1xf32>
      %156 = vector.broadcast %155 : vector<8x1xf32> to vector<8x8xf32>
      %157 = arith.subf %153, %156 : vector<8x8xf32>
      %158 = math.exp %157 : vector<8x8xf32>
      %cst_49 = arith.constant dense<0.000000e+00> : vector<8xf32>
      %159 = vector.multi_reduction <add>, %158, %cst_49 [1] : vector<8x8xf32> to vector<8xf32>
      %160 = vector.shape_cast %159 : vector<8xf32> to vector<8x1xf32>
      %161 = math.log %160 : vector<8x1xf32>
      %162 = arith.addf %155, %161 : vector<8x1xf32>
      %163 = vector.broadcast %162 : vector<8x1xf32> to vector<8x8xf32>
      %164 = arith.subf %153, %163 : vector<8x8xf32>
      %cst_50 = arith.constant dense<0xFF800000> : vector<8xf32>
      %165 = vector.multi_reduction <maximumf>, %164, %cst_50 [0] : vector<8x8xf32> to vector<8xf32>
      %166 = vector.shape_cast %165 : vector<8xf32> to vector<1x8xf32>
      %167 = vector.broadcast %166 : vector<1x8xf32> to vector<8x8xf32>
      %168 = arith.subf %164, %167 : vector<8x8xf32>
      %169 = math.exp %168 : vector<8x8xf32>
      %cst_51 = arith.constant dense<0.000000e+00> : vector<8xf32>
      %170 = vector.multi_reduction <add>, %169, %cst_51 [0] : vector<8x8xf32> to vector<8xf32>
      %171 = vector.shape_cast %170 : vector<8xf32> to vector<1x8xf32>
      %172 = math.log %171 : vector<1x8xf32>
      %173 = arith.addf %166, %172 : vector<1x8xf32>
      %174 = vector.broadcast %173 : vector<1x8xf32> to vector<8x8xf32>
      %175 = arith.subf %164, %174 : vector<8x8xf32>
      %cst_52 = arith.constant dense<0xFF800000> : vector<8xf32>
      %176 = vector.multi_reduction <maximumf>, %175, %cst_52 [1] : vector<8x8xf32> to vector<8xf32>
      %177 = vector.shape_cast %176 : vector<8xf32> to vector<8x1xf32>
      %178 = vector.broadcast %177 : vector<8x1xf32> to vector<8x8xf32>
      %179 = arith.subf %175, %178 : vector<8x8xf32>
      %180 = math.exp %179 : vector<8x8xf32>
      %cst_53 = arith.constant dense<0.000000e+00> : vector<8xf32>
      %181 = vector.multi_reduction <add>, %180, %cst_53 [1] : vector<8x8xf32> to vector<8xf32>
      %182 = vector.shape_cast %181 : vector<8xf32> to vector<8x1xf32>
      %183 = math.log %182 : vector<8x1xf32>
      %184 = arith.addf %177, %183 : vector<8x1xf32>
      %185 = vector.broadcast %184 : vector<8x1xf32> to vector<8x8xf32>
      %186 = arith.subf %175, %185 : vector<8x8xf32>
      %cst_54 = arith.constant dense<0xFF800000> : vector<8xf32>
      %187 = vector.multi_reduction <maximumf>, %186, %cst_54 [0] : vector<8x8xf32> to vector<8xf32>
      %188 = vector.shape_cast %187 : vector<8xf32> to vector<1x8xf32>
      %189 = vector.broadcast %188 : vector<1x8xf32> to vector<8x8xf32>
      %190 = arith.subf %186, %189 : vector<8x8xf32>
      %191 = math.exp %190 : vector<8x8xf32>
      %cst_55 = arith.constant dense<0.000000e+00> : vector<8xf32>
      %192 = vector.multi_reduction <add>, %191, %cst_55 [0] : vector<8x8xf32> to vector<8xf32>
      %193 = vector.shape_cast %192 : vector<8xf32> to vector<1x8xf32>
      %194 = math.log %193 : vector<1x8xf32>
      %195 = arith.addf %188, %194 : vector<1x8xf32>
      %196 = vector.broadcast %195 : vector<1x8xf32> to vector<8x8xf32>
      %197 = arith.subf %186, %196 : vector<8x8xf32>
      %cst_56 = arith.constant dense<0xFF800000> : vector<8xf32>
      %198 = vector.multi_reduction <maximumf>, %197, %cst_56 [1] : vector<8x8xf32> to vector<8xf32>
      %199 = vector.shape_cast %198 : vector<8xf32> to vector<8x1xf32>
      %200 = vector.broadcast %199 : vector<8x1xf32> to vector<8x8xf32>
      %201 = arith.subf %197, %200 : vector<8x8xf32>
      %202 = math.exp %201 : vector<8x8xf32>
      %cst_57 = arith.constant dense<0.000000e+00> : vector<8xf32>
      %203 = vector.multi_reduction <add>, %202, %cst_57 [1] : vector<8x8xf32> to vector<8xf32>
      %204 = vector.shape_cast %203 : vector<8xf32> to vector<8x1xf32>
      %205 = math.log %204 : vector<8x1xf32>
      %206 = arith.addf %199, %205 : vector<8x1xf32>
      %207 = vector.broadcast %206 : vector<8x1xf32> to vector<8x8xf32>
      %208 = arith.subf %197, %207 : vector<8x8xf32>
      %cst_58 = arith.constant dense<0xFF800000> : vector<8xf32>
      %209 = vector.multi_reduction <maximumf>, %208, %cst_58 [0] : vector<8x8xf32> to vector<8xf32>
      %210 = vector.shape_cast %209 : vector<8xf32> to vector<1x8xf32>
      %211 = vector.broadcast %210 : vector<1x8xf32> to vector<8x8xf32>
      %212 = arith.subf %208, %211 : vector<8x8xf32>
      %213 = math.exp %212 : vector<8x8xf32>
      %cst_59 = arith.constant dense<0.000000e+00> : vector<8xf32>
      %214 = vector.multi_reduction <add>, %213, %cst_59 [0] : vector<8x8xf32> to vector<8xf32>
      %215 = vector.shape_cast %214 : vector<8xf32> to vector<1x8xf32>
      %216 = math.log %215 : vector<1x8xf32>
      %217 = arith.addf %210, %216 : vector<1x8xf32>
      %218 = vector.broadcast %217 : vector<1x8xf32> to vector<8x8xf32>
      %219 = arith.subf %208, %218 : vector<8x8xf32>
      %cst_60 = arith.constant dense<0xFF800000> : vector<8xf32>
      %220 = vector.multi_reduction <maximumf>, %219, %cst_60 [1] : vector<8x8xf32> to vector<8xf32>
      %221 = vector.shape_cast %220 : vector<8xf32> to vector<8x1xf32>
      %222 = vector.broadcast %221 : vector<8x1xf32> to vector<8x8xf32>
      %223 = arith.subf %219, %222 : vector<8x8xf32>
      %224 = math.exp %223 : vector<8x8xf32>
      %cst_61 = arith.constant dense<0.000000e+00> : vector<8xf32>
      %225 = vector.multi_reduction <add>, %224, %cst_61 [1] : vector<8x8xf32> to vector<8xf32>
      %226 = vector.shape_cast %225 : vector<8xf32> to vector<8x1xf32>
      %227 = math.log %226 : vector<8x1xf32>
      %228 = arith.addf %221, %227 : vector<8x1xf32>
      %229 = vector.broadcast %228 : vector<8x1xf32> to vector<8x8xf32>
      %230 = arith.subf %219, %229 : vector<8x8xf32>
      %cst_62 = arith.constant dense<0xFF800000> : vector<8xf32>
      %231 = vector.multi_reduction <maximumf>, %230, %cst_62 [0] : vector<8x8xf32> to vector<8xf32>
      %232 = vector.shape_cast %231 : vector<8xf32> to vector<1x8xf32>
      %233 = vector.broadcast %232 : vector<1x8xf32> to vector<8x8xf32>
      %234 = arith.subf %230, %233 : vector<8x8xf32>
      %235 = math.exp %234 : vector<8x8xf32>
      %cst_63 = arith.constant dense<0.000000e+00> : vector<8xf32>
      %236 = vector.multi_reduction <add>, %235, %cst_63 [0] : vector<8x8xf32> to vector<8xf32>
      %237 = vector.shape_cast %236 : vector<8xf32> to vector<1x8xf32>
      %238 = math.log %237 : vector<1x8xf32>
      %239 = arith.addf %232, %238 : vector<1x8xf32>
      %240 = vector.broadcast %239 : vector<1x8xf32> to vector<8x8xf32>
      %241 = arith.subf %230, %240 : vector<8x8xf32>
      %cst_64 = arith.constant dense<0xFF800000> : vector<8xf32>
      %242 = vector.multi_reduction <maximumf>, %241, %cst_64 [1] : vector<8x8xf32> to vector<8xf32>
      %243 = vector.shape_cast %242 : vector<8xf32> to vector<8x1xf32>
      %244 = vector.broadcast %243 : vector<8x1xf32> to vector<8x8xf32>
      %245 = arith.subf %241, %244 : vector<8x8xf32>
      %246 = math.exp %245 : vector<8x8xf32>
      %cst_65 = arith.constant dense<0.000000e+00> : vector<8xf32>
      %247 = vector.multi_reduction <add>, %246, %cst_65 [1] : vector<8x8xf32> to vector<8xf32>
      %248 = vector.shape_cast %247 : vector<8xf32> to vector<8x1xf32>
      %249 = math.log %248 : vector<8x1xf32>
      %250 = arith.addf %243, %249 : vector<8x1xf32>
      %251 = vector.broadcast %250 : vector<8x1xf32> to vector<8x8xf32>
      %252 = arith.subf %241, %251 : vector<8x8xf32>
      %cst_66 = arith.constant dense<0xFF800000> : vector<8xf32>
      %253 = vector.multi_reduction <maximumf>, %252, %cst_66 [0] : vector<8x8xf32> to vector<8xf32>
      %254 = vector.shape_cast %253 : vector<8xf32> to vector<1x8xf32>
      %255 = vector.broadcast %254 : vector<1x8xf32> to vector<8x8xf32>
      %256 = arith.subf %252, %255 : vector<8x8xf32>
      %257 = math.exp %256 : vector<8x8xf32>
      %cst_67 = arith.constant dense<0.000000e+00> : vector<8xf32>
      %258 = vector.multi_reduction <add>, %257, %cst_67 [0] : vector<8x8xf32> to vector<8xf32>
      %259 = vector.shape_cast %258 : vector<8xf32> to vector<1x8xf32>
      %260 = math.log %259 : vector<1x8xf32>
      %261 = arith.addf %254, %260 : vector<1x8xf32>
      %262 = vector.broadcast %261 : vector<1x8xf32> to vector<8x8xf32>
      %263 = arith.subf %252, %262 : vector<8x8xf32>
      %cst_68 = arith.constant dense<0xFF800000> : vector<8xf32>
      %264 = vector.multi_reduction <maximumf>, %263, %cst_68 [1] : vector<8x8xf32> to vector<8xf32>
      %265 = vector.shape_cast %264 : vector<8xf32> to vector<8x1xf32>
      %266 = vector.broadcast %265 : vector<8x1xf32> to vector<8x8xf32>
      %267 = arith.subf %263, %266 : vector<8x8xf32>
      %268 = math.exp %267 : vector<8x8xf32>
      %cst_69 = arith.constant dense<0.000000e+00> : vector<8xf32>
      %269 = vector.multi_reduction <add>, %268, %cst_69 [1] : vector<8x8xf32> to vector<8xf32>
      %270 = vector.shape_cast %269 : vector<8xf32> to vector<8x1xf32>
      %271 = math.log %270 : vector<8x1xf32>
      %272 = arith.addf %265, %271 : vector<8x1xf32>
      %273 = vector.broadcast %272 : vector<8x1xf32> to vector<8x8xf32>
      %274 = arith.subf %263, %273 : vector<8x8xf32>
      %cst_70 = arith.constant dense<0xFF800000> : vector<8xf32>
      %275 = vector.multi_reduction <maximumf>, %274, %cst_70 [0] : vector<8x8xf32> to vector<8xf32>
      %276 = vector.shape_cast %275 : vector<8xf32> to vector<1x8xf32>
      %277 = vector.broadcast %276 : vector<1x8xf32> to vector<8x8xf32>
      %278 = arith.subf %274, %277 : vector<8x8xf32>
      %279 = math.exp %278 : vector<8x8xf32>
      %cst_71 = arith.constant dense<0.000000e+00> : vector<8xf32>
      %280 = vector.multi_reduction <add>, %279, %cst_71 [0] : vector<8x8xf32> to vector<8xf32>
      %281 = vector.shape_cast %280 : vector<8xf32> to vector<1x8xf32>
      %282 = math.log %281 : vector<1x8xf32>
      %283 = arith.addf %276, %282 : vector<1x8xf32>
      %284 = vector.broadcast %283 : vector<1x8xf32> to vector<8x8xf32>
      %285 = arith.subf %274, %284 : vector<8x8xf32>
      %c0_72 = arith.constant 0 : index
      %c0_73 = arith.constant 0 : index
      %c0_74 = arith.constant 0 : index
      %286 = vector.load %arg11[%c0_72, %c0_73, %c0_74] : memref<1x8x8xf32, #tpu.memory_space<vmem>>, vector<1x8x8xf32>
      %287 = vector.shape_cast %286 : vector<1x8x8xf32> to vector<8x8xf32>
      %288 = vector.shape_cast %285 : vector<8x8xf32> to vector<1x8x8xf32>
      tpu.vector_store %arg11[%c0_72, %c0_73, %c0_74], %288 {strides = array<i32>} : memref<1x8x8xf32, #tpu.memory_space<vmem>>, vector<1x8x8xf32>,
    } else {
    }
    return
  }
  func.func @transform_0(%arg0: i32, %arg1: i32) -> (i32, i32, i32) {
    %c0_i32 = arith.constant 0 : i32
    %c0_i32_0 = arith.constant 0 : i32
    %c0_i32_1 = arith.constant 0 : i32
    return %arg0, %c0_i32, %c0_i32_0 : i32, i32, i32
  }
  func.func @transform_1(%arg0: i32, %arg1: i32) -> (i32, i32, i32) {
    %c0_i32 = arith.constant 0 : i32
    %c0_i32_0 = arith.constant 0 : i32
    return %arg0, %arg1, %c0_i32 : i32, i32, i32
  }
  func.func @transform_2(%arg0: i32, %arg1: i32) -> (i32, i32) {
    %c0_i32 = arith.constant 0 : i32
    %c0_i32_0 = arith.constant 0 : i32
    %c0_i32_1 = arith.constant 0 : i32
    return %c0_i32, %c0_i32_0 : i32, i32
  }
  func.func @transform_3(%arg0: i32, %arg1: i32) -> (i32, i32) {
    %c0_i32 = arith.constant 0 : i32
    %c0_i32_0 = arith.constant 0 : i32
    %c0_i32_1 = arith.constant 0 : i32
    return %c0_i32, %c0_i32_0 : i32, i32
  }
  func.func @transform_4(%arg0: i32, %arg1: i32) -> (i32, i32) {
    %c0_i32 = arith.constant 0 : i32
    %c0_i32_0 = arith.constant 0 : i32
    %c0_i32_1 = arith.constant 0 : i32
    return %c0_i32, %c0_i32_0 : i32, i32
  }
  func.func @transform_5(%arg0: i32, %arg1: i32) -> (i32, i32) {
    %c0_i32 = arith.constant 0 : i32
    %c0_i32_0 = arith.constant 0 : i32
    %c0_i32_1 = arith.constant 0 : i32
    return %c0_i32, %c0_i32_0 : i32, i32
  }
  func.func @transform_6(%arg0: i32, %arg1: i32) -> (i32, i32) {
    %c0_i32 = arith.constant 0 : i32
    %c0_i32_0 = arith.constant 0 : i32
    %c0_i32_1 = arith.constant 0 : i32
    return %c0_i32, %c0_i32_0 : i32, i32
  }
  func.func @transform_7(%arg0: i32, %arg1: i32) -> (i32, i32) {
    %c0_i32 = arith.constant 0 : i32
    %c0_i32_0 = arith.constant 0 : i32
    %c0_i32_1 = arith.constant 0 : i32
    return %c0_i32, %c0_i32_0 : i32, i32
  }
  func.func @transform_8(%arg0: i32, %arg1: i32) -> (i32, i32, i32) {
    %c0_i32 = arith.constant 0 : i32
    %c0_i32_0 = arith.constant 0 : i32
    %c0_i32_1 = arith.constant 0 : i32
    return %arg0, %c0_i32, %c0_i32_0 : i32, i32, i32
  }
  func.func @transform_9(%arg0: i32, %arg1: i32) -> (i32, i32, i32) {
    %c0_i32 = arith.constant 0 : i32
    %c0_i32_0 = arith.constant 0 : i32
    %c0_i32_1 = arith.constant 0 : i32
    return %arg0, %c0_i32, %c0_i32_0 : i32, i32, i32
  }
  func.func @transform_10(%arg0: i32, %arg1: i32) -> (i32, i32, i32) {
    %c0_i32 = arith.constant 0 : i32
    %c0_i32_0 = arith.constant 0 : i32
    %c0_i32_1 = arith.constant 0 : i32
    return %arg0, %c0_i32, %c0_i32_0 : i32, i32, i32
  }
}

</mosaic_0001>

<bundles_post_ra>
// kernel: tpu_custom_call.1
= control target key start
LH: loop header
LB: loop body
LE: loop exit
PB: predicated region body
PF: predicated region fallthrough
CT: control target
= control target key end

     0   :  { %s2294_s0 = inlined_call_operand.vmem [shape: f32[2,8,32], index: 0, kind: input, shape index: {}]   ;;  %s2295_s1 = inlined_call_operand.vmem [shape: bf16[2,64,32], index: 1, kind: input, shape index: {}]   ;;  %s2296_s2 = inlined_call_operand.vmem [shape: bf16[32,131], index: 2, kind: input, shape index: {}]   ;;  %s2297_s3 = inlined_call_operand.vmem [shape: f32[1,131], index: 3, kind: input, shape index: {}]   ;;  %s2298_s4 = inlined_call_operand.vmem [shape: bf16[32,64], index: 4, kind: input, shape index: {}]   ;;  %s2299_s5 = inlined_call_operand.vmem [shape: f32[1,64], index: 5, kind: input, shape index: {}]   ;;  %s2300_s6 = inlined_call_operand.vmem [shape: bf16[64,2], index: 6, kind: input, shape index: {}]   ;;  %s2301_s7 = inlined_call_operand.vmem [shape: f32[1,2], index: 7, kind: input, shape index: {}]   ;;  %s2302_s8 = inlined_call_operand.vmem [shape: f32[2,8,3], index: 8, kind: output, shape index: {0}]   ;;  %s2303_s9 = inlined_call_operand.hbm [shape: f32[2,8,8], index: 9, kind: output, shape index: {1}]   ;;  %s2304_s10 = inlined_call_operand.hbm [shape: f32[2,8,8], index: 10, kind: output, shape index: {2}]  }
   0x1   :  { %2306 = sst [smem:[#allocation10_spill]] %s2294_s0 }
   0x2   :  { %2307 = sst [smem:[#allocation11_spill]] %s2295_s1 }
   0x3   :  { %2308 = sst [smem:[#allocation12_spill]] %s2296_s2 }
   0x4   :  { %2309 = sst [smem:[#allocation13_spill]] %s2298_s4 }
   0x5   :  { %16 = vsyncpa [#allocation4], 0 }
   0x6   :  { %18 = vsyncpa [#allocation4 + $0x1], 0 }
   0x7   :  { %19 = vsyncpa [#allocation6], 0 }
   0x8   :  { %21 = vsyncpa [#allocation6 + $0x1], 0  ;;  %s1949_s13 = smov 0   ;;  %s1951_s14 = smov 0  }
   0x9   :  { %s1953_s15 = smov 0   ;;  %s1955_s16 = smov 0  }
   0xa   :  { %s1957_s17 = smov 0   ;;  %s1959_s18 = smov 0  }
   0xb LB: > { %s1497_s19 = sadd.s32 4294967295, %s1887_s18   ;;  %s1498_s20 = sadd.s32 4294967294, %s1887_s18   ;;  %s1887_s18 = sphi %s1959_s18, %s27_s18   ;;  %s1883_s17 = sphi %s1957_s17, %s2322_s17   ;;  %s1879_s16 = sphi %s1955_s16, %s2321_s16   ;;  %s1875_s15 = sphi %s1953_s15, %s2320_s15   ;;  %s1871_s14 = sphi %s1951_s14, %s2319_s14   ;;  %s1867_s13 = sphi %s1949_s13, %s2318_s13  }
   0xc   : > { %s39_s21 = sadd.s32 1, %s1883_s17  ;;  %s252_s22 = sadd.s32 1, %s1875_s15 }
   0xd   : > { %p41_p0 = scmp.ge.s32.totalorder %s39_s21, 2  ;;  %p262_p1 = scmp.ne.s32.totalorder %s1875_s15, %s1871_s14 }
   0xe   : > { %p263_p2 = scmp.eq.s32.totalorder %s1497_s19, 1  ;;  %p268_p3 = scmp.ne.s32.totalorder %s1871_s14, %s1867_s13 }
   0xf   : > { %s2324_s21 = smov (%p41_p0, %s39_s21), 0  ;;  %p269_p5 = scmp.eq.s32.totalorder %s1498_s20, 1 }
  0x10   : > { %2310 = sst [smem:[#allocation9_spill]] %s2324_s21  ;;  %p1989_p4 = por %p263_p2, %p262_p1 }
  0x11   : > { %s249_s24 = ssub.s32 %s1883_s17, %s2324_s21  ;;  %p1501_p6 = scmp.ge.s32.totalorder %s1887_s18, 1 }
  0x12   : > { %p250_p7 = scmp.eq.s32.totalorder %s249_s24, 0  ;;  %p1996_p8 = por %p269_p5, %p268_p3 }
  0x13   : > { %p351_p9 = scmp.lt.s32.totalorder %s1887_s18, 3 }
  0x14   : > { %s2002_s26 = scalar_select %p250_p7, %s1875_s15, %s252_s22  }
  0x15   : > { %p352_p10 = pnand %p1501_p6, %p351_p9 }
  0x16   : > { %s2313_s2 = sld [smem:[#allocation12_spill]] (!%p352_p10)  ;;  %p406_p11 = scmp.lt.s32.totalorder (!%p352_p10), %s1879_s16, 1 }
  0x17   : > { %355 = sbr.rel (%p352_p10) target bundleno = 4076 (0xfec), region = 52  ;;  %s2314_s4 = sld [smem:[#allocation13_spill]] (!%p352_p10) }
  0x18   : > { %s2315_s0 = sld [smem:[#allocation10_spill]] (!%p352_p10)  ;;  %s2147_s22 = sand.u32 (!%p352_p10), 1, %s1871_s14  }
  0x19   : > { %s2316_s1 = sld [smem:[#allocation11_spill]] (!%p352_p10) }
  0x1c   : > { %v1584_v0 = vld [vmem:[%s2313_s2 + $0x14] sm:$0xf]  ;;  %v1520_v1 = vld [vmem:[%s2313_s2 + $0x18] sm:$0xf0]  ;;  %v1582_v4 = vld [vmem:[%s2313_s2 + $0x4] sm:$0xf] }
  0x1d   : > { %v1591_v2 = vld [vmem:[%s2314_s4 + $0x8] sm:$0xff]  ;;  %v1523_v3 = vor.u32 %v1584_v0, %v1520_v1  ;;  %v1590_v6 = vld [vmem:[%s2314_s4] sm:$0xff]  ;;  %s2024_s29 = scalar_select %p406_p11, %s1879_s16, 1  ;;  %vm461_vm0 = vcmask 261120   ;;  %v1518_v11 = vld [vmem:[%s2313_s2 + $0x10] sm:$0xf] }
  0x1e   : > { %v1512_v5 = vld [vmem:[%s2313_s2 + $0x8] sm:$0xf0]  ;;  %1596 = vmatpush.bf16.msra.mxu2 %v1591_v2  ;;  %v1585_v12 = vld [vmem:[%s2313_s2 + $0x14] sm:$0xf0]  ;;  %v1510_v13 = vld [vmem:[%s2313_s2] sm:$0xf] }
  0x1f   : > { %484 = vmatpush.bf16.msra.mxu1 %v1523_v3  ;;  %v1515_v7 = vor.u32 %v1582_v4, %v1512_v5  ;;  %s1504_s30 = sshll.u32 %s2024_s29, 3  ;;  %s1581_s11 = sshll.u32 %s2024_s29, 5  ;;  %v1519_v14 = vor.u32 %v1585_v12, %v1518_v11  ;;  %v1583_v15 = vld [vmem:[%s2313_s2 + $0x4] sm:$0xf0]  ;;  %v435_v20 = vld [vmem:[%s2297_s3] sm:$0x3] }
  0x20   : > { %s409_s20 = scalar_lea.vmem %s2315_s0, %s1504_s30  ;;  %s418_s21 = scalar_lea.vmem %s2316_s1, %s1581_s11  ;;  %v1511_v16 = vor.u32 %v1583_v15, %v1510_v13  ;;  %v438_v21 = vperm.slane %v435_v20, 1  ;;  %vm492_vm1 = vcmask 23552   ;;  %v1693_v24 = vld [vmem:[%s2299_s5] ss:$0 sm:$0xff]  ;;  %v437_v31 = vperm.slane %v435_v20, 0  ;;  %v1595_v63 = vld [vmem:[%s2300_s6 + $0x18] sm:$0xff] }
  0x21   : > { %v429_v8 = vld [vmem:[%s409_s20] sm:$0xff]  ;;  %v1587_v9 = vld [vmem:[%s418_s21 + $0x8] sm:$0xff]  ;;  %471 = vmatpush.bf16.msra.mxu0 %v1519_v14  ;;  %v1588_v17 = vld [vmem:[%s418_s21 + $0x10] sm:$0xff]  ;;  %s423_s12 = scalar_lea.vmem %s2302_s8, %s1504_s30  ;;  %1598 = vmatpush.bf16.msra.mxu3 %v1595_v63  ;;  %vm737_vm2 = vcmask 523264   ;;  %vm821_vm3 = vcmask 1041409   ;;  %vm823_vm4 = vcmask 1042434  }
  0x22   : > { %1597 = vmatpush.bf16.msra.mxu2 %v1590_v6  ;;  %v430_v10 = vpack.c.bf16 %v429_v8, %v429_v8  ;;  %v1586_v18 = vld [vmem:[%s418_s21] sm:$0xff]  ;;  %v1589_v19 = vld [vmem:[%s418_s21 + $0x18] sm:$0xff]  ;;  %s1889_s21 = smov 64   ;;  %v1594_v0 = vld [vmem:[%s2300_s6 + $0x10] sm:$0xff]  ;;  %vm825_vm5 = vcmask 1043459   ;;  %vm827_vm6 = vcmask 1044484  }
  0x23   : > { %485 = vmatpush.bf16.msra.mxu1 %v1515_v7  ;;  %v1593_v4 = vld [vmem:[%s2300_s6 + $0x8] sm:$0xff]  ;;  %v1592_v20 = vld [vmem:[%s2300_s6] sm:$0xff]  ;;  %vm829_vm7 = vcmask 1045509   ;;  %vm831_vm8 = vcmask 1046534   ;;  %vm833_vm9 = vcmask 1047559   ;;  %vm837_vm10 = vcmask 64512  }
  0x24   : > { %s1577_s11 = sshll.u32 %s1879_s16, 3  ;;  %s1797_s4 = scalar_lea.hbm %s2303_s9, 16 }
  0x25   : > { %1551 = vmatmul.msk.bf16.vlgmr.msra.gmra.mxu2 %vm461_vm0, %v1587_v9  ;;  %472 = vmatpush.bf16.msra.mxu0 %v1511_v16  ;;  %s1330_s24 = scalar_lea.hbm %s2303_s9, %s1577_s11 }
  0x26   : > { %1525 = vmatmul.msk.bf16.vlgmr.msra.gmra.mxu1 %vm461_vm0, %v430_v10  ;;  %1599 = vmatpush.bf16.msra.mxu3 %v1594_v0  ;;  %s1334_s28 = sshll.u32 %s1330_s24, 4  ;;  %s1335_s28 = int_to_ptr.hbm [resolvable:$true] %s1334_s28 }
  0x27   : > { %570 = vmatpush.bf16.msrb.mxu1 %v1591_v2  ;;  %s1791_s19 = sshra.s32 %s1335_s28, 4  ;;  %s1792_s19 = int_to_ptr.hbm [resolvable:$true] %s1791_s19 }
  0x28   : > { %1524 = vmatmul.msk.bf16.vlgmr.msra.gmra.mxu0 %vm461_vm0, %v430_v10  ;;  %p1798_p1 = scmp.lt.s32.totalorder %s1792_s19, %s2303_s9 }
  0x29   : > { %754 = vmatpush.bf16.msrb.mxu0 %v1595_v63 }
  0x2a   : > { %1600 = vmatpush.bf16.msra.mxu3 %v1593_v4 }
  0x2b   : > { %571 = vmatpush.bf16.msrb.mxu1 %v1590_v6 }
  0x2d   : > { %755 = vmatpush.bf16.msrb.mxu0 %v1594_v0  ;;  %v811_v0 = vlaneseq }
  0x2e   : > { %1601 = vmatpush.bf16.msra.mxu3 %v1592_v20 }
  0x31   : > { %756 = vmatpush.bf16.msrb.mxu0 %v1593_v4 }
  0x35   : > { %1552 = vmatmul.msk.bf16.gmra.mxu2 %vm461_vm0, %v1588_v17  ;;  %757 = vmatpush.bf16.msrb.mxu0 %v1592_v20 }
  0x36   : > { %1550 = vmatmul.msk.bf16.vlgmr.msrb.gmra.mxu1 %vm461_vm0, %v1586_v18 }
  0x45   : > { %1553 = vmatmul.msk.bf16.gmra.mxu2 %vm461_vm0, %v1589_v19 }
  0xa3   : > { %v487_v22 = vpop.f32.mrf.mxu1 }
  0xa4   : > { %v488_v23 = vadd.f32 %v487_v22, %v438_v21 }
  0xa5   : > { %v474_v32 = vpop.f32.mrf.mxu0 }
  0xa6   : > { %494 = vst.msk [vmem:[%s423_s12] sm:$0xff] %vm492_vm1, %v488_v23  ;;  %v2067_v34 = vadd.f32 %v474_v32, %v437_v31  ;;  %s1312_s12 = scalar_lea.sflag [#allocation4], %s2147_s22 }
  0xa8   : > { %v578_v25 = vpop.f32.mrf.mxu2  ;;  %v594_v47 = vrot.slane %v2067_v34, 1  ;;  %v601_v48 = vperm.slane %v2067_v34, 0  ;;  %v595_v55 = vrot.slane %v2067_v34, 2  ;;  %v596_v56 = vrot.slane %v2067_v34, 3 }
  0xa9   : > { %v579_v26 = vadd.f32 %v1693_v24, %v578_v25  ;;  %v597_v2 = vrot.slane %v2067_v34, 4  ;;  %v598_v3 = vrot.slane %v2067_v34, 5  ;;  %v599_v11 = vrot.slane %v2067_v34, 6 }
  0xaa   : > { %v602_v49 = vperm.slane %v594_v47, 0  ;;  %v603_v57 = vperm.slane %v595_v55, 0  ;;  %v604_v58 = vperm.slane %v596_v56, 0  ;;  %v600_v12 = vrot.slane %v2067_v34, 7  ;;  %v1694_v47 = vld [vmem:[%s2301_s7] ss:$0 sm:$0xff] }
  0xab   : > { %v489_v27 = vpop.f32.mrf.mxu1  ;;  %629 = vrot.lane.b32.xlu0 %v579_v26, %s1889_s21  ;;  %v605_v5 = vperm.slane %v597_v2, 0  ;;  %v606_v6 = vperm.slane %v598_v3, 0  ;;  %v607_v14 = vperm.slane %v599_v11, 0  ;;  %v2138_v3 = vand.u32 127, %v811_v0 }
  0xac   : > { %v608_v15 = vperm.slane %v600_v12, 0 }
  0xad   : > { %v476_v38 = vpop.f32.mrf.mxu0 }
  0xb0   : > { %v580_v28 = vpop.f32.mrf.mxu2 }
  0xb1   : > { %v581_v29 = vadd.f32 %v1693_v24, %v580_v28 }
  0xb3   : > { %v573_v30 = vpop.f32.mrf.mxu1  ;;  %631 = vrot.lane.b32.xlu0 %v581_v29, %s1889_s21 }
  0xb4   : > { %v574_v33 = vadd.f32 %v1693_v24, %v573_v30 }
  0xb6   : > { %625 = vrot.lane.b32.xlu2 %v574_v33, %s1889_s21 }
  0xb8   : > { %v583_v35 = vpop.f32.mrf.mxu2 }
  0xb9   : > { %v584_v36 = vadd.f32 %v1693_v24, %v583_v35 }
  0xbb   : > { %v575_v37 = vpop.f32.mrf.mxu1  ;;  %633 = vrot.lane.b32.xlu1 %v584_v36, %s1889_s21 }
  0xbc   : > { %v576_v39 = vadd.f32 %v1693_v24, %v575_v37 }
  0xbe   : > { %627 = vrot.lane.b32.xlu2 %v576_v39, %s1889_s21 }
  0xc0   : > { %v585_v40 = vpop.f32.mrf.mxu2 }
  0xc1   : > { %v586_v41 = vadd.f32 %v1693_v24, %v585_v40 }
  0xc3   : > { %635 = vrot.lane.b32.xlu1 %v586_v41, %s1889_s21 }
  0xc8   : > { %v588_v42 = vpop.f32.mrf.mxu2 }
  0xc9   : > { %v589_v43 = vadd.f32 %v1693_v24, %v588_v42 }
  0xcb   : > { %637 = vrot.lane.b32.xlu0 %v589_v43, %s1889_s21 }
  0xd0   : > { %v590_v44 = vpop.f32.mrf.mxu2 }
  0xd1   : > { %v591_v45 = vadd.f32 %v1693_v24, %v590_v44 }
  0xd3   : > { %639 = vrot.lane.b32.xlu1 %v591_v45, %s1889_s21 }
 0x110   : > { %v626_v46 = vpop.permute.xlu2 %625 }
 0x111   : > { %v649_v50 = vadd.f32 %v626_v46, %v601_v48  ;;  %v1890_v46 = vmov 0  }
 0x112   : > { %1687 = vset.pattern.permute.xlu2 %v1890_v46  ;;  %1688 = vset.pattern.permute.xlu0 %v1890_v46 }
 0x113   : > { %1689 = vset.pattern.permute.xlu1 %v1890_v46 }
 0x118   : > { %v628_v51 = vpop.permute.xlu2 %627 }
 0x119   : > { %v650_v52 = vadd.f32 %v628_v51, %v602_v49 }
 0x11b   : > { %v1677_v53 = vpack.i.bf16 %v650_v52, %v649_v50 }
 0x11d   : > { %1678 = vrot.lane.b32.xlu1 %v1677_v53, %s1889_s21  ;;  %v630_v54 = vpop.permute.xlu0 %629 }
 0x11e   : > { %v651_v60 = vadd.f32 %v630_v54, %v603_v57 }
 0x125   : > { %v632_v59 = vpop.permute.xlu0 %631 }
 0x126   : > { %v652_v61 = vadd.f32 %v632_v59, %v604_v58 }
 0x128   : > { %v1667_v62 = vpack.i.bf16 %v652_v61, %v651_v60 }
 0x12a   : > { %1668 = vrot.lane.b32.xlu2 %v1667_v62, %s1889_s21 }
 0x12d   : > { %v634_v1 = vpop.permute.xlu1 %633 }
 0x12e   : > { %v653_v8 = vadd.f32 %v634_v1, %v605_v5 }
 0x135   : > { %v636_v7 = vpop.permute.xlu1 %635 }
 0x136   : > { %v654_v9 = vadd.f32 %v636_v7, %v606_v6 }
 0x138   : > { %v1672_v10 = vpack.i.bf16 %v654_v9, %v653_v8 }
 0x13a   : > { %1673 = vrot.lane.b32.xlu0 %v1672_v10, %s1889_s21 }
 0x13d   : > { %v638_v13 = vpop.permute.xlu0 %637 }
 0x13e   : > { %v655_v17 = vadd.f32 %v638_v13, %v607_v14 }
 0x145   : > { %v640_v16 = vpop.permute.xlu1 %639 }
 0x146   : > { %v656_v18 = vadd.f32 %v640_v16, %v608_v15 }
 0x148   : > { %v1682_v19 = vpack.i.bf16 %v656_v18, %v655_v17 }
 0x14a   : > { %1683 = vrot.lane.b32.xlu2 %v1682_v19, %s1889_s21  ;;  %s1502_s21 = sshll.u32 %s2147_s22, 3 }
 0x14b   : > { %s2161_s29 = scalar_lea.vmem [#allocation3], %s1502_s21  ;;  %s2231_s30 = scalar_lea.vmem [#allocation5], %s1502_s21 }
 0x14c   : > { %s1332_s27 = sshll.u32 %s2161_s29, 4  ;;  %s1793_s21 = scalar_lea.hbm %s1792_s19, 8  ;;  %s1333_s27 = int_to_ptr.vmem [resolvable:$true] %s1332_s27 }
 0x14d   : > { %p1794_p12 = scmp.ne.s32.totalorder %s1792_s19, %s1793_s21  ;;  %p1799_p2 = scmp.lt.s32.totalorder %s1797_s4, %s1793_s21 }
 0x14f   : > { %p1795_p13 = pnand %p1794_p12, %p1989_p4  ;;  %p1800_p3 = por %p1799_p2, %p1798_p1 }
 0x151   : > { %p1796_p0 = pneg %p1795_p13 }
 0x153   : > { %p1801_p5 = pnand %p1800_p3, %p1796_p0 }
 0x184   : > { %v1669_v21 = vpop.permute.xlu2 %1668 }
 0x185   : > { %v1671_v22 = vunpack.i.h.bf16 %v1669_v21  ;;  %v1670_v23 = vunpack.i.l.bf16 %v1669_v21 }
 0x187   : > { %v691_v24 = vmax.f32 %v2067_v34, %v1670_v23  ;;  %v692_v25 = vmax.f32 %v2067_v34, %v1671_v22 }
 0x189   : > { %v698_v26 = vpack.c.bf16 %v692_v25, %v691_v24  ;;  %v1891_v25 = vmov 0.1  }
 0x18a   : > { %1695 = vrcp.f32 %v1891_v25 }
 0x18b   : > { %1571 = vmatmul.msk.bf16.vlgmr.msra.gmra.mxu3 %vm737_vm2, %v698_v26 }
 0x18f   : > { %v1679_v27 = vpop.permute.xlu1 %1678 }
 0x190   : > { %v1681_v28 = vunpack.i.h.bf16 %v1679_v27  ;;  %v1680_v29 = vunpack.i.l.bf16 %v1679_v27  ;;  %v1696_v26 = vpop.eup %1695 }
 0x191   : > { %v952_v27 = vmul.f32 0.1, %v1696_v26  ;;  %vm956_vm12 = vweird.f32 %v1696_v26 }
 0x192   : > { %v689_v30 = vmax.f32 %v2067_v34, %v1680_v29  ;;  %v690_v31 = vmax.f32 %v2067_v34, %v1681_v28  ;;  %v960_v29 = vshrl.u32 %v811_v0, 7 }
 0x193   : > { %v953_v28 = vsub.f32 1.0, %v952_v27 }
 0x194   : > { %v697_v32 = vpack.c.bf16 %v690_v31, %v689_v30  ;;  %vm961_vm11 = vcmp.eq.s32.totalorder %v960_v29, %v2138_v3 }
 0x195   : > { %v954_v30 = vmul.f32 %v1696_v26, %v953_v28 }
 0x196   : > { %1570 = vmatmul.msk.bf16.vlgmr.msrb.gmra.mxu0 %vm737_vm2, %v697_v32  ;;  %v1892_v32 = vmov 0.0  }
 0x197   : > { %v955_v31 = vadd.f32 %v1696_v26, %v954_v30 }
 0x1a4   : > { %v1684_v40 = vpop.permute.xlu2 %1683 }
 0x1a5   : > { %v1686_v41 = vunpack.i.h.bf16 %v1684_v40  ;;  %v1685_v42 = vunpack.i.l.bf16 %v1684_v40 }
 0x1a7   : > { %v695_v43 = vmax.f32 %v2067_v34, %v1685_v42  ;;  %v696_v44 = vmax.f32 %v2067_v34, %v1686_v41 }
 0x1a9   : > { %v700_v45 = vpack.c.bf16 %v696_v44, %v695_v43 }
 0x1ac   : > { %v1674_v33 = vpop.permute.xlu0 %1673 }
 0x1ad   : > { %v1676_v35 = vunpack.i.h.bf16 %v1674_v33  ;;  %v1675_v36 = vunpack.i.l.bf16 %v1674_v33  ;;  %v1574_v33 = vsel %vm961_vm11, 1.0, %v1892_v32 }
 0x1af   : > { %v693_v37 = vmax.f32 %v2067_v34, %v1675_v36  ;;  %v694_v38 = vmax.f32 %v2067_v34, %v1676_v35  ;;  %v957_v35 = vsel %vm956_vm12, %v1696_v26, %v955_v31  ;;  %v964_v36 = vmul.f32 1000000.0, %v1574_v33 }
 0x1b1   : > { %v699_v39 = vpack.c.bf16 %v694_v38, %v693_v37 }
 0x1b3   : > { %1572 = vmatmul.msk.bf16.gmra.mxu3 %vm737_vm2, %v699_v39 }
 0x1c3   : > { %1573 = vmatmul.msk.bf16.gmra.mxu3 %vm737_vm2, %v700_v45 }
 0x20e   : > { %v764_v48 = vpop.f32.mrf.mxu3 }
 0x20f   : > { %v2114_v49 = vadd.f32 %v1694_v47, %v764_v48 }
 0x211   : > { %794 = vperm.xlu2 %1687, %v2114_v49  }
 0x213   : > { %v759_v50 = vpop.f32.mrf.mxu0 }
 0x214   : > { %v2117_v51 = vadd.f32 %v1694_v47, %v759_v50 }
 0x216   : > { %788 = vperm.xlu0 %1688, %v2117_v51   ;;  %v766_v34 = vpop.f32.mrf.mxu3 }
 0x217   : > { %v2120_v52 = vadd.f32 %v1694_v47, %v766_v34 }
 0x219   : > { %797 = vperm.xlu1 %1689, %v2120_v52  }
 0x21b   : > { %v761_v53 = vpop.f32.mrf.mxu0 }
 0x21c   : > { %v2123_v54 = vadd.f32 %v1694_v47, %v761_v53 }
 0x221   : > { %791 = vperm.xlu1 %1689, %v2123_v54  }
 0x236   : > { %v769_v55 = vpop.f32.mrf.mxu3 }
 0x237   : > { %v2126_v56 = vadd.f32 %v1694_v47, %v769_v55 }
 0x239   : > { %800 = vperm.xlu2 %1687, %v2126_v56  }
 0x23e   : > { %v771_v57 = vpop.f32.mrf.mxu3 }
 0x23f   : > { %v2129_v58 = vadd.f32 %v1694_v47, %v771_v57 }
 0x241   : > { %803 = vperm.xlu0 %1688, %v2129_v58  }
 0x246   : > { %v774_v59 = vpop.f32.mrf.mxu3 }
 0x247   : > { %v2132_v60 = vadd.f32 %v1694_v47, %v774_v59 }
 0x249   : > { %806 = vperm.xlu1 %1689, %v2132_v60  }
 0x24e   : > { %v776_v61 = vpop.f32.mrf.mxu3 }
 0x24f   : > { %v2135_v62 = vadd.f32 %v1694_v47, %v776_v61 }
 0x251   : > { %809 = vperm.xlu2 %1687, %v2135_v62  }
 0x26b   : > { %v795_v1 = vpop.permute.xlu2 %794 }
 0x26c   : > { %v815_v9 = vperm.slane %v795_v1, %v2138_v3 }
 0x288   : > { %v789_v4 = vpop.permute.xlu0 %788 }
 0x289   : > { %v813_v6 = vperm.slane %v789_v4, %v2138_v3  ;;  %v1893_v4 = vmov 1  }
 0x28a   : > { %1691 = vset.pattern.permute.xlu2 %v1893_v4  ;;  %1690 = vset.pattern.permute.xlu1 %v1893_v4 }
 0x28b   : > { %v798_v63 = vpop.permute.xlu1 %797 }
 0x28c   : > { %v816_v12 = vperm.slane %v798_v63, %v2138_v3 }
 0x293   : > { %v792_v2 = vpop.permute.xlu1 %791  ;;  %v801_v7 = vpop.permute.xlu2 %800 }
 0x294   : > { %v814_v5 = vperm.slane %v792_v2, %v2138_v3  ;;  %v817_v15 = vperm.slane %v801_v7, %v2138_v3 }
 0x296   : > { %v822_v8 = vsel %vm821_vm3, %v814_v5, %v813_v6 }
 0x297   : > { %v824_v10 = vsel %vm823_vm4, %v815_v9, %v822_v8 }
 0x298   : > { %v826_v13 = vsel %vm825_vm5, %v816_v12, %v824_v10 }
 0x299   : > { %v828_v18 = vsel %vm827_vm6, %v817_v15, %v826_v13 }
 0x2ab   : > { %v810_v16 = vpop.permute.xlu2 %809 }
 0x2ac   : > { %v820_v20 = vperm.slane %v810_v16, %v2138_v3 }
 0x2b3   : > { %v804_v11 = vpop.permute.xlu0 %803 }
 0x2b4   : > { %v818_v14 = vperm.slane %v804_v11, %v2138_v3 }
 0x2b6   : > { %v830_v21 = vsel %vm829_vm7, %v818_v14, %v828_v18 }
 0x2bb   : > { %v807_v17 = vpop.permute.xlu1 %806 }
 0x2bc   : > { %v819_v19 = vperm.slane %v807_v17, %v2138_v3 }
 0x2be   : > { %v832_v22 = vsel %vm831_vm8, %v819_v19, %v830_v21 }
 0x2bf   : > { %v834_v23 = vsel %vm833_vm9, %v820_v20, %v832_v22 }
 0x2c0   : > { %838 = vst.msk [vmem:[%s2161_s29] sm:$0xff] %vm837_vm10, %v834_v23 }
 0x2c7   : > { %v918_v24 = vld [vmem:[%s2161_s29] sm:$0xff] }
 0x2c8   : > { %919 = vxpose.xlu0.b32.start.end [1/1] (short) (narrow) %v918_v24, 8 }
 0x32f   : > { %1692 = vset.pattern.permute.xlu0 %v1893_v4 }
 0x36c   : > { %v935_v37 = vpop.trf.xlu0 }
 0x36d   : > { %v958_v38 = vmul.f32 %v957_v35, %v935_v37 }
 0x36f   : > { %v965_v39 = vsub.f32 %v958_v38, %v964_v36 }
 0x371   : > { %v966_v40 = vsel %vm837_vm10, %v965_v39, -inf }
 0x372   : > { %967 = vmax.xlane.f32.xlu1 %v966_v40 }
 0x3e5   : > { %v968_v41 = vpop.xlane.xlu1 %967 }
 0x3e6   : > { %v969_v42 = vsub.f32 %v965_v39, %v968_v41 }
 0x3e8   : > { %v970_v43 = vmul.f32 1.442695, %v969_v42 }
 0x3ea   : > { %1697 = vpow2.f32 %v970_v43 }
 0x3f0   : > { %v1698_v44 = vpop.eup %1697 }
 0x3f1   : > { %v972_v45 = vsel %vm837_vm10, %v1698_v44, 0.0 }
 0x3f2   : > { %973 = vadd.xlane.f32.xlu2 %v972_v45 }
 0x465   : > { %v974_v46 = vpop.xlane.xlu2 %973 }
 0x466   : > { %1699 = vlog2.f32 %v974_v46 }
 0x46c   : > { %v1700_v47 = vpop.eup %1699 }
 0x46d   : > { %v976_v48 = vmul.f32 0.6931472, %v1700_v47 }
 0x46f   : > { %v977_v50 = vadd.f32 %v976_v48, %v968_v41 }
 0x471   : > { %v978_v34 = vsub.f32 %v965_v39, %v977_v50 }
 0x473   : > { %v979_v53 = vsel %vm837_vm10, %v978_v34, -inf }
 0x474   : > { %v980_v55 = vrot.slane %v979_v53, 4 }
 0x476   : > { %v981_v57 = vmax.f32 %v979_v53, %v980_v55 }
 0x478   : > { %v982_v59 = vrot.slane %v981_v57, 2 }
 0x47a   : > { %v983_v61 = vmax.f32 %v981_v57, %v982_v59 }
 0x47c   : > { %v984_v63 = vrot.slane %v983_v61, 1 }
 0x47e   : > { %v985_v0 = vmax.f32 %v983_v61, %v984_v63 }
 0x480   : > { %v986_v1 = vsub.f32 %v978_v34, %v985_v0 }
 0x482   : > { %v987_v2 = vmul.f32 1.442695, %v986_v1 }
 0x484   : > { %1701 = vpow2.f32 %v987_v2 }
 0x48a   : > { %v1702_v5 = vpop.eup %1701 }
 0x48b   : > { %v989_v6 = vsel %vm837_vm10, %v1702_v5, 0.0 }
 0x48c   : > { %v990_v7 = vrot.slane %v989_v6, 4 }
 0x48e   : > { %v991_v8 = vadd.f32 %v990_v7, %v989_v6 }
 0x490   : > { %v992_v9 = vrot.slane %v991_v8, 2 }
 0x492   : > { %v993_v10 = vadd.f32 %v992_v9, %v991_v8 }
 0x494   : > { %v994_v11 = vrot.slane %v993_v10, 1 }
 0x496   : > { %v995_v12 = vadd.f32 %v994_v11, %v993_v10 }
 0x498   : > { %1703 = vlog2.f32 %v995_v12 }
 0x49e   : > { %v1704_v13 = vpop.eup %1703 }
 0x49f   : > { %v997_v14 = vmul.f32 0.6931472, %v1704_v13 }
 0x4a1   : > { %v998_v15 = vadd.f32 %v997_v14, %v985_v0 }
 0x4a3   : > { %v999_v16 = vsub.f32 %v978_v34, %v998_v15 }
 0x4a5   : > { %v1000_v17 = vsel %vm837_vm10, %v999_v16, -inf }
 0x4a6   : > { %1001 = vmax.xlane.f32.xlu0 %v1000_v17 }
 0x4ba   : > { %858 = vperm.xlu0 %1692, %v2132_v60  }
 0x519   : > { %v1002_v18 = vpop.xlane.xlu0 %1001 }
 0x51a   : > { %v1003_v19 = vsub.f32 %v999_v16, %v1002_v18 }
 0x51c   : > { %v1004_v20 = vmul.f32 1.442695, %v1003_v19 }
 0x51e   : > { %1705 = vpow2.f32 %v1004_v20 }
 0x524   : > { %v1706_v21 = vpop.eup %1705 }
 0x525   : > { %v1006_v22 = vsel %vm837_vm10, %v1706_v21, 0.0 }
 0x526   : > { %1007 = vadd.xlane.f32.xlu2 %v1006_v22 }
 0x599   : > { %v1008_v23 = vpop.xlane.xlu2 %1007 }
 0x59a   : > { %1707 = vlog2.f32 %v1008_v23 }
 0x5a0   : > { %v1708_v24 = vpop.eup %1707 }
 0x5a1   : > { %v1010_v25 = vmul.f32 0.6931472, %v1708_v24 }
 0x5a3   : > { %v1011_v26 = vadd.f32 %v1010_v25, %v1002_v18 }
 0x5a5   : > { %v1012_v27 = vsub.f32 %v999_v16, %v1011_v26 }
 0x5a7   : > { %v1013_v28 = vsel %vm837_vm10, %v1012_v27, -inf }
 0x5a8   : > { %v1014_v29 = vrot.slane %v1013_v28, 4 }
 0x5aa   : > { %v1015_v30 = vmax.f32 %v1013_v28, %v1014_v29 }
 0x5ac   : > { %v1016_v31 = vrot.slane %v1015_v30, 2 }
 0x5ae   : > { %v1017_v60 = vmax.f32 %v1015_v30, %v1016_v31 }
 0x5b0   : > { %v1018_v32 = vrot.slane %v1017_v60, 1 }
 0x5b2   : > { %v1019_v33 = vmax.f32 %v1017_v60, %v1018_v32 }
 0x5b4   : > { %v1020_v35 = vsub.f32 %v1012_v27, %v1019_v33 }
 0x5b6   : > { %v1021_v36 = vmul.f32 1.442695, %v1020_v35 }
 0x5b8   : > { %1709 = vpow2.f32 %v1021_v36 }
 0x5be   : > { %v1710_v37 = vpop.eup %1709 }
 0x5bf   : > { %v1023_v38 = vsel %vm837_vm10, %v1710_v37, 0.0 }
 0x5c0   : > { %v1024_v39 = vrot.slane %v1023_v38, 4 }
 0x5c2   : > { %v1025_v40 = vadd.f32 %v1024_v39, %v1023_v38 }
 0x5c4   : > { %v1026_v41 = vrot.slane %v1025_v40, 2 }
 0x5c6   : > { %v1027_v42 = vadd.f32 %v1026_v41, %v1025_v40 }
 0x5c8   : > { %v1028_v43 = vrot.slane %v1027_v42, 1 }
 0x5ca   : > { %v1029_v44 = vadd.f32 %v1028_v43, %v1027_v42 }
 0x5cc   : > { %1711 = vlog2.f32 %v1029_v44 }
 0x5d2   : > { %v1712_v45 = vpop.eup %1711 }
 0x5d3   : > { %v1031_v46 = vmul.f32 0.6931472, %v1712_v45 }
 0x5d5   : > { %v1032_v47 = vadd.f32 %v1031_v46, %v1019_v33 }
 0x5d7   : > { %v1033_v48 = vsub.f32 %v1012_v27, %v1032_v47 }
 0x5d9   : > { %v1034_v50 = vsel %vm837_vm10, %v1033_v48, -inf }
 0x5da   : > { %1035 = vmax.xlane.f32.xlu1 %v1034_v50 }
 0x64d   : > { %v1036_v34 = vpop.xlane.xlu1 %1035 }
 0x64e   : > { %v1037_v53 = vsub.f32 %v1033_v48, %v1036_v34 }
 0x650   : > { %v1038_v55 = vmul.f32 1.442695, %v1037_v53 }
 0x652   : > { %1713 = vpow2.f32 %v1038_v55 }
 0x658   : > { %v1714_v57 = vpop.eup %1713 }
 0x659   : > { %v1040_v59 = vsel %vm837_vm10, %v1714_v57, 0.0 }
 0x65a   : > { %1041 = vadd.xlane.f32.xlu2 %v1040_v59 }
 0x6cd   : > { %v1042_v61 = vpop.xlane.xlu2 %1041 }
 0x6ce   : > { %1715 = vlog2.f32 %v1042_v61 }
 0x6d4   : > { %v1716_v63 = vpop.eup %1715 }
 0x6d5   : > { %v1044_v0 = vmul.f32 0.6931472, %v1716_v63 }
 0x6d7   : > { %v1045_v1 = vadd.f32 %v1044_v0, %v1036_v34 }
 0x6d9   : > { %v1046_v2 = vsub.f32 %v1033_v48, %v1045_v1 }
 0x6db   : > { %v1047_v4 = vsel %vm837_vm10, %v1046_v2, -inf }
 0x6dc   : > { %v1048_v5 = vrot.slane %v1047_v4, 4 }
 0x6de   : > { %v1049_v6 = vmax.f32 %v1047_v4, %v1048_v5 }
 0x6e0   : > { %v1050_v7 = vrot.slane %v1049_v6, 2 }
 0x6e2   : > { %v1051_v8 = vmax.f32 %v1049_v6, %v1050_v7 }
 0x6e4   : > { %v1052_v9 = vrot.slane %v1051_v8, 1 }
 0x6e6   : > { %v1053_v10 = vmax.f32 %v1051_v8, %v1052_v9 }
 0x6e8   : > { %v1054_v11 = vsub.f32 %v1046_v2, %v1053_v10 }
 0x6ea   : > { %v1055_v12 = vmul.f32 1.442695, %v1054_v11 }
 0x6ec   : > { %1717 = vpow2.f32 %v1055_v12 }
 0x6f2   : > { %v1718_v13 = vpop.eup %1717 }
 0x6f3   : > { %v1057_v14 = vsel %vm837_vm10, %v1718_v13, 0.0 }
 0x6f4   : > { %v1058_v15 = vrot.slane %v1057_v14, 4 }
 0x6f6   : > { %v1059_v16 = vadd.f32 %v1058_v15, %v1057_v14 }
 0x6f8   : > { %v1060_v17 = vrot.slane %v1059_v16, 2 }
 0x6fa   : > { %v1061_v18 = vadd.f32 %v1060_v17, %v1059_v16 }
 0x6fc   : > { %v1062_v19 = vrot.slane %v1061_v18, 1 }
 0x6fe   : > { %v1063_v20 = vadd.f32 %v1062_v19, %v1061_v18 }
 0x700   : > { %1719 = vlog2.f32 %v1063_v20 }
 0x706   : > { %v1720_v21 = vpop.eup %1719 }
 0x707   : > { %v1065_v22 = vmul.f32 0.6931472, %v1720_v21 }
 0x709   : > { %v1066_v23 = vadd.f32 %v1065_v22, %v1053_v10 }
 0x70b   : > { %v1067_v24 = vsub.f32 %v1046_v2, %v1066_v23 }
 0x70d   : > { %v1068_v25 = vsel %vm837_vm10, %v1067_v24, -inf }
 0x70e   : > { %1069 = vmax.xlane.f32.xlu1 %v1068_v25 }
 0x781   : > { %v1070_v26 = vpop.xlane.xlu1 %1069 }
 0x782   : > { %v1071_v27 = vsub.f32 %v1067_v24, %v1070_v26 }
 0x784   : > { %v1072_v28 = vmul.f32 1.442695, %v1071_v27 }
 0x786   : > { %1721 = vpow2.f32 %v1072_v28 }
 0x78c   : > { %v1722_v29 = vpop.eup %1721 }
 0x78d   : > { %v1074_v30 = vsel %vm837_vm10, %v1722_v29, 0.0 }
 0x78e   : > { %1075 = vadd.xlane.f32.xlu2 %v1074_v30 }
 0x801   : > { %v1076_v31 = vpop.xlane.xlu2 %1075 }
 0x802   : > { %1723 = vlog2.f32 %v1076_v31 }
 0x808   : > { %v1724_v60 = vpop.eup %1723 }
 0x809   : > { %v1078_v32 = vmul.f32 0.6931472, %v1724_v60 }
 0x80b   : > { %v1079_v33 = vadd.f32 %v1078_v32, %v1070_v26 }
 0x80d   : > { %v1080_v35 = vsub.f32 %v1067_v24, %v1079_v33 }
 0x80f   : > { %v1081_v36 = vsel %vm837_vm10, %v1080_v35, -inf }
 0x810   : > { %v1082_v37 = vrot.slane %v1081_v36, 4 }
 0x812   : > { %v1083_v38 = vmax.f32 %v1081_v36, %v1082_v37 }
 0x814   : > { %v1084_v39 = vrot.slane %v1083_v38, 2 }
 0x816   : > { %v1085_v40 = vmax.f32 %v1083_v38, %v1084_v39 }
 0x818   : > { %v1086_v41 = vrot.slane %v1085_v40, 1 }
 0x81a   : > { %v1087_v42 = vmax.f32 %v1085_v40, %v1086_v41 }
 0x81c   : > { %v1088_v43 = vsub.f32 %v1080_v35, %v1087_v42 }
 0x81e   : > { %v1089_v44 = vmul.f32 1.442695, %v1088_v43 }
 0x820   : > { %1725 = vpow2.f32 %v1089_v44 }
 0x826   : > { %v1726_v45 = vpop.eup %1725 }
 0x827   : > { %v1091_v46 = vsel %vm837_vm10, %v1726_v45, 0.0 }
 0x828   : > { %v1092_v47 = vrot.slane %v1091_v46, 4 }
 0x82a   : > { %v1093_v48 = vadd.f32 %v1092_v47, %v1091_v46 }
 0x82c   : > { %v1094_v50 = vrot.slane %v1093_v48, 2 }
 0x82e   : > { %v1095_v34 = vadd.f32 %v1094_v50, %v1093_v48 }
 0x830   : > { %v1096_v53 = vrot.slane %v1095_v34, 1 }
 0x832   : > { %v1097_v55 = vadd.f32 %v1096_v53, %v1095_v34 }
 0x834   : > { %1727 = vlog2.f32 %v1097_v55 }
 0x83a   : > { %v1728_v57 = vpop.eup %1727 }
 0x83b   : > { %v1099_v59 = vmul.f32 0.6931472, %v1728_v57 }
 0x83d   : > { %v1100_v61 = vadd.f32 %v1099_v59, %v1087_v42 }
 0x83f   : > { %v1101_v63 = vsub.f32 %v1080_v35, %v1100_v61 }
 0x841   : > { %v1102_v0 = vsel %vm837_vm10, %v1101_v63, -inf }
 0x842   : > { %1103 = vmax.xlane.f32.xlu1 %v1102_v0 }
 0x8b5   : > { %v1104_v1 = vpop.xlane.xlu1 %1103 }
 0x8b6   : > { %v1105_v2 = vsub.f32 %v1101_v63, %v1104_v1 }
 0x8b8   : > { %v1106_v4 = vmul.f32 1.442695, %v1105_v2 }
 0x8ba   : > { %1729 = vpow2.f32 %v1106_v4 }
 0x8c0   : > { %v1730_v5 = vpop.eup %1729 }
 0x8c1   : > { %v1108_v6 = vsel %vm837_vm10, %v1730_v5, 0.0 }
 0x8c2   : > { %1109 = vadd.xlane.f32.xlu2 %v1108_v6 }
 0x935   : > { %v1110_v7 = vpop.xlane.xlu2 %1109 }
 0x936   : > { %1731 = vlog2.f32 %v1110_v7 }
 0x93c   : > { %v1732_v8 = vpop.eup %1731 }
 0x93d   : > { %v1112_v9 = vmul.f32 0.6931472, %v1732_v8 }
 0x93f   : > { %v1113_v10 = vadd.f32 %v1112_v9, %v1104_v1 }
 0x941   : > { %v1114_v11 = vsub.f32 %v1101_v63, %v1113_v10 }
 0x943   : > { %v1115_v12 = vsel %vm837_vm10, %v1114_v11, -inf }
 0x944   : > { %v1116_v13 = vrot.slane %v1115_v12, 4 }
 0x946   : > { %v1117_v14 = vmax.f32 %v1115_v12, %v1116_v13 }
 0x948   : > { %v1118_v15 = vrot.slane %v1117_v14, 2 }
 0x94a   : > { %v1119_v16 = vmax.f32 %v1117_v14, %v1118_v15 }
 0x94c   : > { %v1120_v17 = vrot.slane %v1119_v16, 1 }
 0x94e   : > { %v1121_v18 = vmax.f32 %v1119_v16, %v1120_v17 }
 0x950   : > { %v1122_v19 = vsub.f32 %v1114_v11, %v1121_v18 }
 0x952   : > { %v1123_v20 = vmul.f32 1.442695, %v1122_v19 }
 0x954   : > { %1733 = vpow2.f32 %v1123_v20 }
 0x95a   : > { %v1734_v21 = vpop.eup %1733 }
 0x95b   : > { %v1125_v22 = vsel %vm837_vm10, %v1734_v21, 0.0 }
 0x95c   : > { %v1126_v23 = vrot.slane %v1125_v22, 4 }
 0x95e   : > { %v1127_v24 = vadd.f32 %v1126_v23, %v1125_v22 }
 0x960   : > { %v1128_v25 = vrot.slane %v1127_v24, 2 }
 0x962   : > { %v1129_v26 = vadd.f32 %v1128_v25, %v1127_v24 }
 0x964   : > { %v1130_v27 = vrot.slane %v1129_v26, 1 }
 0x966   : > { %v1131_v28 = vadd.f32 %v1130_v27, %v1129_v26 }
 0x968   : > { %1735 = vlog2.f32 %v1131_v28 }
 0x96e   : > { %v1736_v29 = vpop.eup %1735 }
 0x96f   : > { %v1133_v30 = vmul.f32 0.6931472, %v1736_v29 }
 0x971   : > { %v1134_v31 = vadd.f32 %v1133_v30, %v1121_v18 }
 0x973   : > { %v1135_v60 = vsub.f32 %v1114_v11, %v1134_v31 }
 0x975   : > { %v1136_v32 = vsel %vm837_vm10, %v1135_v60, -inf }
 0x976   : > { %1137 = vmax.xlane.f32.xlu1 %v1136_v32 }
 0x9e9   : > { %v1138_v33 = vpop.xlane.xlu1 %1137 }
 0x9ea   : > { %v1139_v35 = vsub.f32 %v1135_v60, %v1138_v33 }
 0x9ec   : > { %v1140_v36 = vmul.f32 1.442695, %v1139_v35 }
 0x9ee   : > { %1737 = vpow2.f32 %v1140_v36 }
 0x9f4   : > { %v1738_v37 = vpop.eup %1737 }
 0x9f5   : > { %v1142_v38 = vsel %vm837_vm10, %v1738_v37, 0.0 }
 0x9f6   : > { %1143 = vadd.xlane.f32.xlu2 %v1142_v38 }
 0xa69   : > { %v1144_v39 = vpop.xlane.xlu2 %1143 }
 0xa6a   : > { %1739 = vlog2.f32 %v1144_v39 }
 0xa70   : > { %v1740_v40 = vpop.eup %1739 }
 0xa71   : > { %v1146_v41 = vmul.f32 0.6931472, %v1740_v40 }
 0xa73   : > { %v1147_v42 = vadd.f32 %v1146_v41, %v1138_v33 }
 0xa75   : > { %v1148_v43 = vsub.f32 %v1135_v60, %v1147_v42 }
 0xa77   : > { %v1149_v44 = vsel %vm837_vm10, %v1148_v43, -inf }
 0xa78   : > { %v1150_v45 = vrot.slane %v1149_v44, 4 }
 0xa7a   : > { %v1151_v46 = vmax.f32 %v1149_v44, %v1150_v45 }
 0xa7c   : > { %v1152_v47 = vrot.slane %v1151_v46, 2 }
 0xa7e   : > { %v1153_v48 = vmax.f32 %v1151_v46, %v1152_v47 }
 0xa80   : > { %v1154_v50 = vrot.slane %v1153_v48, 1 }
 0xa82   : > { %v1155_v34 = vmax.f32 %v1153_v48, %v1154_v50 }
 0xa84   : > { %v1156_v53 = vsub.f32 %v1148_v43, %v1155_v34 }
 0xa86   : > { %v1157_v55 = vmul.f32 1.442695, %v1156_v53 }
 0xa88   : > { %1741 = vpow2.f32 %v1157_v55 }
 0xa8e   : > { %v1742_v57 = vpop.eup %1741 }
 0xa8f   : > { %v1159_v59 = vsel %vm837_vm10, %v1742_v57, 0.0 }
 0xa90   : > { %v1160_v61 = vrot.slane %v1159_v59, 4 }
 0xa92   : > { %v1161_v63 = vadd.f32 %v1160_v61, %v1159_v59 }
 0xa94   : > { %v1162_v0 = vrot.slane %v1161_v63, 2 }
 0xa96   : > { %v1163_v1 = vadd.f32 %v1162_v0, %v1161_v63 }
 0xa98   : > { %v1164_v2 = vrot.slane %v1163_v1, 1 }
 0xa9a   : > { %v1165_v4 = vadd.f32 %v1164_v2, %v1163_v1 }
 0xa9c   : > { %1743 = vlog2.f32 %v1165_v4 }
 0xaa2   : > { %v1744_v5 = vpop.eup %1743 }
 0xaa3   : > { %v1167_v6 = vmul.f32 0.6931472, %v1744_v5 }
 0xaa5   : > { %v1168_v7 = vadd.f32 %v1167_v6, %v1155_v34 }
 0xaa7   : > { %v1169_v8 = vsub.f32 %v1148_v43, %v1168_v7 }
 0xaa9   : > { %v1170_v9 = vsel %vm837_vm10, %v1169_v8, -inf }
 0xaaa   : > { %1171 = vmax.xlane.f32.xlu1 %v1170_v9 }
 0xb1d   : > { %v1172_v10 = vpop.xlane.xlu1 %1171 }
 0xb1e   : > { %v1173_v11 = vsub.f32 %v1169_v8, %v1172_v10 }
 0xb20   : > { %v1174_v12 = vmul.f32 1.442695, %v1173_v11 }
 0xb22   : > { %1745 = vpow2.f32 %v1174_v12 }
 0xb28   : > { %v1746_v13 = vpop.eup %1745 }
 0xb29   : > { %v1176_v14 = vsel %vm837_vm10, %v1746_v13, 0.0 }
 0xb2a   : > { %1177 = vadd.xlane.f32.xlu2 %v1176_v14 }
 0xb9d   : > { %v1178_v15 = vpop.xlane.xlu2 %1177 }
 0xb9e   : > { %1747 = vlog2.f32 %v1178_v15 }
 0xba4   : > { %v1748_v16 = vpop.eup %1747 }
 0xba5   : > { %v1180_v17 = vmul.f32 0.6931472, %v1748_v16 }
 0xba7   : > { %v1181_v18 = vadd.f32 %v1180_v17, %v1172_v10 }
 0xba9   : > { %v1182_v19 = vsub.f32 %v1169_v8, %v1181_v18 }
 0xbab   : > { %v1183_v20 = vsel %vm837_vm10, %v1182_v19, -inf }
 0xbac   : > { %v1184_v21 = vrot.slane %v1183_v20, 4 }
 0xbae   : > { %v1185_v22 = vmax.f32 %v1183_v20, %v1184_v21 }
 0xbb0   : > { %v1186_v23 = vrot.slane %v1185_v22, 2 }
 0xbb2   : > { %v1187_v24 = vmax.f32 %v1185_v22, %v1186_v23 }
 0xbb4   : > { %v1188_v25 = vrot.slane %v1187_v24, 1 }
 0xbb6   : > { %v1189_v26 = vmax.f32 %v1187_v24, %v1188_v25 }
 0xbb8   : > { %v1190_v27 = vsub.f32 %v1182_v19, %v1189_v26 }
 0xbba   : > { %v1191_v28 = vmul.f32 1.442695, %v1190_v27 }
 0xbbc   : > { %1749 = vpow2.f32 %v1191_v28 }
 0xbc2   : > { %v1750_v29 = vpop.eup %1749 }
 0xbc3   : > { %v1193_v30 = vsel %vm837_vm10, %v1750_v29, 0.0 }
 0xbc4   : > { %v1194_v31 = vrot.slane %v1193_v30, 4 }
 0xbc6   : > { %v1195_v60 = vadd.f32 %v1194_v31, %v1193_v30 }
 0xbc8   : > { %v1196_v32 = vrot.slane %v1195_v60, 2 }
 0xbca   : > { %v1197_v33 = vadd.f32 %v1196_v32, %v1195_v60 }
 0xbcc   : > { %v1198_v35 = vrot.slane %v1197_v33, 1 }
 0xbce   : > { %v1199_v36 = vadd.f32 %v1198_v35, %v1197_v33 }
 0xbd0   : > { %1751 = vlog2.f32 %v1199_v36 }
 0xbd6   : > { %v1752_v37 = vpop.eup %1751 }
 0xbd7   : > { %v1201_v38 = vmul.f32 0.6931472, %v1752_v37 }
 0xbd9   : > { %v1202_v39 = vadd.f32 %v1201_v38, %v1189_v26 }
 0xbdb   : > { %v1203_v40 = vsub.f32 %v1182_v19, %v1202_v39 }
 0xbdd   : > { %v1204_v41 = vsel %vm837_vm10, %v1203_v40, -inf }
 0xbde   : > { %1205 = vmax.xlane.f32.xlu1 %v1204_v41 }
 0xc51   : > { %v1206_v42 = vpop.xlane.xlu1 %1205 }
 0xc52   : > { %v1207_v43 = vsub.f32 %v1203_v40, %v1206_v42 }
 0xc54   : > { %v1208_v44 = vmul.f32 1.442695, %v1207_v43 }
 0xc56   : > { %1753 = vpow2.f32 %v1208_v44 }
 0xc5c   : > { %v1754_v45 = vpop.eup %1753 }
 0xc5d   : > { %v1210_v46 = vsel %vm837_vm10, %v1754_v45, 0.0 }
 0xc5e   : > { %1211 = vadd.xlane.f32.xlu2 %v1210_v46 }
 0xcd1   : > { %v1212_v47 = vpop.xlane.xlu2 %1211 }
 0xcd2   : > { %1755 = vlog2.f32 %v1212_v47 }
 0xcd8   : > { %v1756_v48 = vpop.eup %1755 }
 0xcd9   : > { %v1214_v50 = vmul.f32 0.6931472, %v1756_v48 }
 0xcdb   : > { %v1215_v34 = vadd.f32 %v1214_v50, %v1206_v42 }
 0xcdd   : > { %v1216_v53 = vsub.f32 %v1203_v40, %v1215_v34 }
 0xcdf   : > { %v1217_v55 = vsel %vm837_vm10, %v1216_v53, -inf }
 0xce0   : > { %v1218_v57 = vrot.slane %v1217_v55, 4 }
 0xce2   : > { %v1219_v59 = vmax.f32 %v1217_v55, %v1218_v57 }
 0xce4   : > { %v1220_v61 = vrot.slane %v1219_v59, 2 }
 0xce6   : > { %v1221_v63 = vmax.f32 %v1219_v59, %v1220_v61 }
 0xce8   : > { %v1222_v0 = vrot.slane %v1221_v63, 1 }
 0xcea   : > { %v1223_v1 = vmax.f32 %v1221_v63, %v1222_v0 }
 0xcec   : > { %v1224_v2 = vsub.f32 %v1216_v53, %v1223_v1 }
 0xcee   : > { %v1225_v4 = vmul.f32 1.442695, %v1224_v2 }
 0xcf0   : > { %1757 = vpow2.f32 %v1225_v4 }
 0xcf6   : > { %v1758_v5 = vpop.eup %1757 }
 0xcf7   : > { %v1227_v6 = vsel %vm837_vm10, %v1758_v5, 0.0  ;;  %v859_v5 = vpop.permute.xlu0 %858 }
 0xcf8   : > { %v1228_v7 = vrot.slane %v1227_v6, 4 }
 0xcfa   : > { %v1229_v8 = vadd.f32 %v1228_v7, %v1227_v6 }
 0xcfc   : > { %v1230_v9 = vrot.slane %v1229_v8, 2 }
 0xcfe   : > { %v1231_v10 = vadd.f32 %v1230_v9, %v1229_v8 }
 0xd00   : > { %v1232_v11 = vrot.slane %v1231_v10, 1 }
 0xd02   : > { %v1233_v12 = vadd.f32 %v1232_v11, %v1231_v10 }
 0xd04   : > { %1759 = vlog2.f32 %v1233_v12  ;;  %v869_v12 = vperm.slane %v859_v5, %v2138_v3 }
 0xd0a   : > { %v1760_v13 = vpop.eup %1759 }
 0xd0b   : > { %v1235_v14 = vmul.f32 0.6931472, %v1760_v13 }
 0xd0d   : > { %v1236_v15 = vadd.f32 %v1235_v14, %v1223_v1 }
 0xd0f   : > { %v1237_v16 = vsub.f32 %v1216_v53, %v1236_v15 }
 0xd11   : > { %v1238_v17 = vsel %vm837_vm10, %v1237_v16, -inf }
 0xd12   : > { %1239 = vmax.xlane.f32.xlu1 %v1238_v17 }
 0xd85   : > { %v1240_v18 = vpop.xlane.xlu1 %1239 }
 0xd86   : > { %v1241_v19 = vsub.f32 %v1237_v16, %v1240_v18 }
 0xd88   : > { %v1242_v20 = vmul.f32 1.442695, %v1241_v19 }
 0xd8a   : > { %1761 = vpow2.f32 %v1242_v20 }
 0xd90   : > { %v1762_v21 = vpop.eup %1761 }
 0xd91   : > { %v1244_v22 = vsel %vm837_vm10, %v1762_v21, 0.0 }
 0xd92   : > { %1245 = vadd.xlane.f32.xlu2 %v1244_v22 }
 0xdaa   : > { %843 = vperm.xlu2 %1691, %v2123_v54  }
 0xdb2   : > { %849 = vperm.xlu2 %1691, %v2120_v52  }
 0xe05   : > { %v1246_v23 = vpop.xlane.xlu2 %1245 }
 0xe06   : > { %1763 = vlog2.f32 %v1246_v23 }
 0xe0c   : > { %v1764_v24 = vpop.eup %1763 }
 0xe0d   : > { %v1248_v25 = vmul.f32 0.6931472, %v1764_v24  ;;  %v844_v59 = vpop.permute.xlu2 %843 }
 0xe0e   : > { %v864_v0 = vperm.slane %v844_v59, %v2138_v3 }
 0xe0f   : > { %v1249_v26 = vadd.f32 %v1248_v25, %v1240_v18 }
 0xe11   : > { %v1250_v27 = vsub.f32 %v1237_v16, %v1249_v26 }
 0xe13   : > { %v1251_v28 = vsel %vm837_vm10, %v1250_v27, -inf }
 0xe14   : > { %v1252_v29 = vrot.slane %v1251_v28, 4 }
 0xe16   : > { %v1253_v30 = vmax.f32 %v1251_v28, %v1252_v29 }
 0xe18   : > { %v1254_v31 = vrot.slane %v1253_v30, 2 }
 0xe1a   : > { %v1255_v60 = vmax.f32 %v1253_v30, %v1254_v31 }
 0xe1c   : > { %v1256_v32 = vrot.slane %v1255_v60, 1 }
 0xe1e   : > { %v1257_v33 = vmax.f32 %v1255_v60, %v1256_v32 }
 0xe20   : > { %v1258_v35 = vsub.f32 %v1250_v27, %v1257_v33 }
 0xe22   : > { %v1259_v36 = vmul.f32 1.442695, %v1258_v35 }
 0xe24   : > { %1765 = vpow2.f32 %v1259_v36 }
 0xe2a   : > { %v1766_v54 = vpop.eup %1765 }
 0xe2b   : > { %v1261_v52 = vsel %vm837_vm10, %v1766_v54, 0.0 }
 0xe2c   : > { %v1262_v37 = vrot.slane %v1261_v52, 4 }
 0xe2e   : > { %v1263_v38 = vadd.f32 %v1262_v37, %v1261_v52 }
 0xe30   : > { %v1264_v39 = vrot.slane %v1263_v38, 2 }
 0xe32   : > { %v1265_v40 = vadd.f32 %v1264_v39, %v1263_v38 }
 0xe34   : > { %v1266_v41 = vrot.slane %v1265_v40, 1 }
 0xe36   : > { %v1267_v42 = vadd.f32 %v1266_v41, %v1265_v40 }
 0xe38   : > { %1767 = vlog2.f32 %v1267_v42 }
 0xe3e   : > { %v1768_v43 = vpop.eup %1767 }
 0xe3f   : > { %v1269_v44 = vmul.f32 0.6931472, %v1768_v43 }
 0xe41   : > { %v1270_v45 = vadd.f32 %v1269_v44, %v1257_v33 }
 0xe43   : > { %v1271_v46 = vsub.f32 %v1250_v27, %v1270_v45 }
 0xe45   : > { %v1272_v47 = vsel %vm837_vm10, %v1271_v46, -inf }
 0xe46   : > { %1273 = vmax.xlane.f32.xlu1 %v1272_v47 }
 0xe5f   : > { %840 = vperm.xlu1 %1690, %v2117_v51   ;;  %v850_v51 = vpop.permute.xlu2 %849 }
 0xe60   : > { %v866_v6 = vperm.slane %v850_v51, %v2138_v3 }
 0xe67   : > { %846 = vperm.xlu1 %1690, %v2114_v49  }
 0xe6f   : > { %852 = vperm.xlu1 %1690, %v2126_v56  }
 0xe77   : > { %861 = vperm.xlu1 %1690, %v2135_v62  }
 0xeb9   : > { %v1274_v48 = vpop.xlane.xlu1 %1273 }
 0xeba   : > { %v1275_v50 = vsub.f32 %v1271_v46, %v1274_v48 }
 0xebc   : > { %v1276_v34 = vmul.f32 1.442695, %v1275_v50 }
 0xebe   : > { %1769 = vpow2.f32 %v1276_v34 }
 0xec4   : > { %v1770_v53 = vpop.eup %1769 }
 0xec5   : > { %v1278_v55 = vsel %vm837_vm10, %v1770_v53, 0.0 }
 0xec6   : > { %1279 = vadd.xlane.f32.xlu2 %v1278_v55 }
 0xed1   : > { %v841_v57 = vpop.permute.xlu1 %840 }
 0xed2   : > { %v863_v56 = vperm.slane %v841_v57, %v2138_v3 }
 0xed4   : > { %v871_v1 = vsel %vm821_vm3, %v864_v0, %v863_v56 }
 0xed9   : > { %v847_v61 = vpop.permute.xlu1 %846 }
 0xeda   : > { %v865_v62 = vperm.slane %v847_v61, %v2138_v3 }
 0xedc   : > { %v872_v2 = vsel %vm823_vm4, %v865_v62, %v871_v1 }
 0xedd   : > { %v873_v10 = vsel %vm825_vm5, %v866_v6, %v872_v2 }
 0xede   : > { %855 = vperm.xlu2 %1691, %v2129_v58  }
 0xee1   : > { %v853_v63 = vpop.permute.xlu1 %852 }
 0xee2   : > { %v867_v4 = vperm.slane %v853_v63, %v2138_v3 }
 0xee4   : > { %v874_v13 = vsel %vm827_vm6, %v867_v4, %v873_v10 }
 0xee9   : > { %v862_v7 = vpop.permute.xlu1 %861 }
 0xeea   : > { %v870_v15 = vperm.slane %v862_v7, %v2138_v3 }
 0xf39   : > { %v1280_v49 = vpop.xlane.xlu2 %1279 }
 0xf3a   : > { %1771 = vlog2.f32 %v1280_v49 }
 0xf40   : > { %v1772_v58 = vpop.eup %1771 }
 0xf41   : > { %v1282_v8 = vmul.f32 0.6931472, %v1772_v58  ;;  %v856_v9 = vpop.permute.xlu2 %855 }
 0xf42   : > { %v868_v11 = vperm.slane %v856_v9, %v2138_v3 }
 0xf43   : > { %v1283_v14 = vadd.f32 %v1282_v8, %v1274_v48 }
 0xf44   : > { %v875_v16 = vsel %vm829_vm7, %v868_v11, %v874_v13 }
 0xf45   : > { %v1284_v17 = vsub.f32 %v1271_v46, %v1283_v14  ;;  %v876_v18 = vsel %vm831_vm8, %v869_v12, %v875_v16 }
 0xf46   : > { %v877_v19 = vsel %vm833_vm9, %v870_v15, %v876_v18 }
 0xf47   : > { %v1285_v20 = vsel %vm837_vm10, %v1284_v17, -inf  ;;  %880 = vst.msk [vmem:[%s2231_s30] sm:$0xff] %vm837_vm10, %v877_v19 }
 0xf48   : > { %v1286_v21 = vrot.slane %v1285_v20, 4 }
 0xf4a   : > { %v1287_v22 = vmax.f32 %v1285_v20, %v1286_v21 }
 0xf4c   : > { %v1288_v23 = vrot.slane %v1287_v22, 2 }
 0xf4e   : > { %v1289_v3 = vmax.f32 %v1287_v22, %v1288_v23  ;;  %v884_v24 = vld [vmem:[%s2231_s30] sm:$0xff] }
 0xf4f   : > { %885 = vxpose.xlu2.b32.start.end [1/1] (short) (narrow) %v884_v24, 8 }
 0xf50   : > { %v1290_v25 = vrot.slane %v1289_v3, 1 }
 0xf52   : > { %v1291_v26 = vmax.f32 %v1289_v3, %v1290_v25 }
 0xf54   : > { %v1292_v27 = vsub.f32 %v1284_v17, %v1291_v26 }
 0xf56   : > { %v1293_v28 = vmul.f32 1.442695, %v1292_v27 }
 0xf58   : > { %1773 = vpow2.f32 %v1293_v28 }
 0xf5e   : > { %v1774_v29 = vpop.eup %1773 }
 0xf5f   : > { %v1295_v30 = vsel %vm837_vm10, %v1774_v29, 0.0 }
 0xf60   : > { %v1296_v31 = vrot.slane %v1295_v30, 4 }
 0xf62   : > { %v1297_v60 = vadd.f32 %v1296_v31, %v1295_v30 }
 0xf64   : > { %v1298_v32 = vrot.slane %v1297_v60, 2 }
 0xf66   : > { %v1299_v33 = vadd.f32 %v1298_v32, %v1297_v60 }
 0xf68   : > { %v1300_v35 = vrot.slane %v1299_v33, 1 }
 0xf6a   : > { %v1301_v36 = vadd.f32 %v1300_v35, %v1299_v33 }
 0xf6c   : > { %1775 = vlog2.f32 %v1301_v36 }
 0xf72   : > { %v1776_v54 = vpop.eup %1775 }
 0xf73   : > { %v1303_v52 = vmul.f32 0.6931472, %v1776_v54 }
 0xf75   : > { %v1304_v37 = vadd.f32 %v1303_v52, %v1291_v26 }
 0xf77   : > { %v1305_v38 = vsub.f32 %v1284_v17, %v1304_v37 }
 0xf79   : > { %1306 = vst.msk [vmem:[%s2161_s29] sm:$0xff] %vm837_vm10, %v1305_v38 }
 0xf7a   : > { %1804 = shalt.err (!%p1801_p5)
}
 0xf7b   : > { %1602 = dma.vmem_to_hbm [thread:$0]  (%p1989_p4), %s1333_s27, 128, %s1335_s28, %s1312_s12  }
 0xf7c   : > { %s1344_s16 = scalar_lea.hbm %s2304_s10, %s1577_s11  ;;  %s1346_s20 = sshll.u32 %s2231_s30, 4  ;;  %s1347_s20 = int_to_ptr.vmem [resolvable:$true] %s1346_s20 }
 0xf7d   : > { %s1348_s2 = sshll.u32 %s1344_s16, 4  ;;  %s1317_s0 = scalar_lea.sflag [#allocation6], %s2147_s22  ;;  %s1349_s2 = int_to_ptr.hbm [resolvable:$true] %s1348_s2 }
 0xf7e   : > { %s1819_s19 = sshra.s32 %s1349_s2, 4  ;;  %s1825_s1 = scalar_lea.hbm %s2304_s10, 16  ;;  %s1820_s19 = int_to_ptr.hbm [resolvable:$true] %s1819_s19 }
 0xf7f   : > { %s1821_s21 = scalar_lea.hbm %s1820_s19, 8  ;;  %p1826_p10 = scmp.lt.s32.totalorder %s1820_s19, %s2304_s10 }
 0xf80   : > { %p1822_p6 = scmp.ne.s32.totalorder %s1820_s19, %s1821_s21  ;;  %p1827_p11 = scmp.lt.s32.totalorder %s1825_s1, %s1821_s21 }
 0xf82   : > { %p1823_p7 = pnand %p1822_p6, %p1989_p4  ;;  %p1828_p12 = por %p1827_p11, %p1826_p10 }
 0xf84   : > { %p1824_p9 = pneg %p1823_p7 }
 0xf86   : > { %p1829_p13 = pnand %p1828_p12, %p1824_p9 }
 0xfe8   : > { %v901_v39 = vpop.trf.xlu2 }
 0xfe9   : > { %917 = vst.msk [vmem:[%s2231_s30] sm:$0xff] %vm837_vm10, %v901_v39 }
 0xfea   : > { %1832 = shalt.err (!%p1829_p13)
}
 0xfeb   : > { %1603 = dma.vmem_to_hbm [thread:$0]  (%p1989_p4), %s1347_s20, 128, %s1349_s2, %s1317_s0  }
 0xfec PF: > { %p1613_p0 = scmp.ge.s32.totalorder %s1887_s18, 2  ;;  %s1367_s22 = sand.u32 1, %s1867_s13  }
 0xfed   : > { %s1368_s30 = scalar_lea.sflag [#allocation4], %s1367_s22 }
 0xfee   : > { %p1607_p1 = pnand %p1613_p0, %p1996_p8 }
 0xff0   : > { %p1608_p2 = pneg %p1607_p1 }
 0xff2   : > { %1858 = dma.done.wait (%p1608_p2), %s1368_s30, 128  }
 0xff3   : > { %1860 = vsyncadd (%p1608_p2), %s1368_s30, 4294967168  ;;  %s1378_s4 = scalar_lea.sflag [#allocation6], %s1367_s22 }
 0xff4   : > { %1862 = dma.done.wait (%p1608_p2), %s1378_s4, 128  }
 0xff5   : > { %1864 = vsyncadd (%p1608_p2), %s1378_s4, 4294967168  ;;  %s27_s18 = sadd.s32 1, %s1887_s18   ;;  %s2317_s2 = sld [smem:[#allocation9_spill]] }
 0xff6   : > { %p24_p3 = scmp.ge.s32.totalorder %s27_s18, 4   ;;  %s2318_s13 = smov %s1871_s14 }
 0xff7   : > { %s2319_s14 = smov %s1875_s15  ;;  %s2320_s15 = smov %s2002_s26 }
 0xff8   : > { %s2321_s16 = smov %s1883_s17  ;;  %26 = sbr.rel (!%p24_p3) target bundleno = 11 (0xb), region = 130 }
 0xffb   : > { %s2322_s17 = smov %s2317_s2 }
 0xffd   :  { %1384 = vsyncpa [#allocation4], 1 }
 0xffe   :  { %1386 = vsyncpa [#allocation4 + $0x1], 1 }
 0xfff   :  { %1387 = vsyncpa [#allocation6], 1 }
0x1000   :  { %1389 = vsyncpa [#allocation6 + $0x1], 1 }

</bundles_post_ra>
